<compile_context>
chip_gen: v7x
topology: tpu7x:2x2x1
jax: 0.10.0
libtpu: 0.0.40
codegen_flags: <defaults>
</compile_context>

<pallas_src>
import functools

import jax
import jax.numpy as jnp
from jax.experimental import pallas as pl
from jax.experimental.pallas import tpu as pltpu


def _pos_tagger_kernel(tok_ref, tab_ref, wout_ref, bout_ref, o_ref, *,
                       nb, token_len, vocab, emb_size):
    # tok_ref:  (1, 1, T*nb) int32  char ids, lane order (char-pos major, token minor)
    # tab_ref:  (4E, V)  fused table^T: [emb | W0@emb | W1@emb + b_conv | W2@emb] rows
    # wout_ref: (LP, E)  output linear weight (rows zero-padded L -> LP)
    # bout_ref: (LP, nb) output bias, pre-tiled along tokens
    # o_ref:    (LP, nb) logits^T for this block of nb tokens
    T, E, V = token_len, emb_size, vocab
    C = T * nb

    # --- fused embedding + conv-tap gather: one-hot @ table on the MXU ------
    tok = tok_ref[0]                                               # (1, C)
    vids = jax.lax.broadcasted_iota(jnp.int32, (V, C), 0)
    onehot = (vids == tok).astype(jnp.float32)                     # (V, C)
    # NOTE: out-of-range ids (<0 or >=V) silently map to an all-zero column,
    # unlike torch.Embedding which would raise.
    a = jnp.dot(tab_ref[...], onehot,
                preferred_element_type=jnp.float32)                # (4E, C)

    x_emb = a[0:E, :]            # emb[tok]            (residual input)
    ac0 = a[E:2 * E, :]          # W0 @ emb[tok]
    ac1 = a[2 * E:3 * E, :]      # W1 @ emb[tok] + b_conv
    ac2 = a[3 * E:4 * E, :]      # W2 @ emb[tok]

    # --- Conv1d(k=3, pad=1): neighbours are +-nb lanes (whole-vreg shifts) ---
    if T > 1:
        zero = jnp.zeros((E, nb), jnp.float32)
        prev = jnp.concatenate([zero, ac0[:, :C - nb]], axis=1)    # x[t-1] tap
        nxt = jnp.concatenate([ac2[:, nb:], zero], axis=1)         # x[t+1] tap
        y = prev + ac1 + nxt
    else:
        y = ac1
    # Dropout(p=0.0) is identity; LeakyReLU(negative_slope=0.01).
    y = jnp.where(y > 0, y, 0.01 * y)
    x = x_emb + y                                                  # residual

    # --- AdaptiveMaxPool1d(1) over chars: T-1 aligned elementwise maxima ----
    g = x[:, 0:nb]
    for t in range(1, T):
        g = jnp.maximum(g, x[:, t * nb:(t + 1) * nb])              # (E, nb)

    # --- output Linear, transposed + lane-dense ------------------------------
    logits = jnp.dot(wout_ref[...], g, preferred_element_type=jnp.float32)
    o_ref[...] = (logits + bout_ref[...]).astype(o_ref.dtype)


def single_token_pos_tagger(tokens, params, *, nb=256):
    """tokens: (B, S, T) int32.  Returns logits (B, L, S) float32."""
    emb = params["emb"]          # (V, E), row 0 zeroed (padding_idx=0)
    wconv = params["wconv"]      # (E, E, 3)  PyTorch Conv1d layout (out, in, K)
    bconv = params["bconv"]      # (E,)
    wout = params["wout"]        # (L, E)     PyTorch Linear layout
    bout = params["bout"]        # (L,)

    B, S, T = tokens.shape
    V, E = emb.shape
    L = wout.shape[0]
    LP = pl.cdiv(L, 8) * 8       # sublane-pad the label axis

    N = B * S
    # nb: tokens per grid step; must be a multiple of 128 (lane alignment of the
    # shift/pool slices and of the output block).  Clamp so we (a) don't
    # overshoot the workload and (b) get >=2 grid steps when possible (v7x has
    # 2 TensorCores; v5e/v6e are single-TC so this is free there).
    nb = max(128, (int(nb) // 128) * 128)
    nb = min(nb, max(128, pl.cdiv(N, 128) * 128))
    if pl.cdiv(N, 128) >= 2:
        nb = min(nb, max(128, pl.cdiv(pl.cdiv(N, 2), 128) * 128))
    n_pad = pl.cdiv(N, nb) * nb
    n_blocks = n_pad // nb

    # ---- char ids: (n_blocks, 1, T*nb), lane order = (char-pos, token) ------
    tok = tokens.reshape(N, T).astype(jnp.int32)
    if n_pad != N:
        tok = jnp.pad(tok, ((0, n_pad - N), (0, 0)))   # id 0 = padding char
    tok_ln = (tok.reshape(n_blocks, nb, T)
              .transpose(0, 2, 1)
              .reshape(n_blocks, 1, T * nb))

    # ---- fused gather table (conv taps + conv bias folded into the lookup) --
    c0 = emb @ wconv[:, :, 0].T
    c1 = emb @ wconv[:, :, 1].T + bconv[None, :]   # the current-char tap always
    c2 = emb @ wconv[:, :, 2].T                    # fires, so the bias folds here
    tab_t = jnp.concatenate([emb, c0, c1, c2], axis=1).T.astype(jnp.float32)

    wout_p = jnp.zeros((LP, E), jnp.float32).at[:L].set(wout.astype(jnp.float32))
    bout_t = jnp.zeros((LP, nb), jnp.float32).at[:L].set(
        jnp.broadcast_to(bout.astype(jnp.float32)[:, None], (L, nb)))

    kernel = functools.partial(_pos_tagger_kernel, nb=nb, token_len=T,
                               vocab=V, emb_size=E)

    out = pl.pallas_call(
        kernel,
        out_shape=jax.ShapeDtypeStruct((LP, n_pad), jnp.float32),
        grid_spec=pltpu.PrefetchScalarGridSpec(
            num_scalar_prefetch=0,
            grid=(n_blocks,),
            in_specs=[
                pl.BlockSpec((1, 1, T * nb), lambda i: (i, 0, 0)),  # char ids
                pl.BlockSpec((4 * E, V), lambda i: (0, 0)),         # fused table
                pl.BlockSpec((LP, E), lambda i: (0, 0)),            # out weight
                pl.BlockSpec((LP, nb), lambda i: (0, 0)),           # out bias
            ],
            out_specs=pl.BlockSpec((LP, nb), lambda i: (0, i)),
        ),
        compiler_params=pltpu.CompilerParams(
            dimension_semantics=("parallel",)),
    )(tok_ln, tab_t, wout_p, bout_t)

    logits = out[:L, :N]                                # (L, N)
    return logits.reshape(L, B, S).transpose(1, 0, 2)   # (B, L, S)


def reference(tokens, params):
    """Pure-JAX reference matching the PyTorch forward (eval mode)."""
    emb, wconv, bconv = params["emb"], params["wconv"], params["bconv"]
    wout, bout = params["wout"], params["bout"]
    B, S, T = tokens.shape
    L = wout.shape[0]
    x = jnp.take(emb, tokens.reshape(B * S, T), axis=0)           # (N, T, E)
    x_ncw = x.transpose(0, 2, 1)                                  # (N, E, T)
    y = jax.lax.conv_general_dilated(
        x_ncw, wconv, window_strides=(1,), padding=[(1, 1)],
        dimension_numbers=("NCH", "OIH", "NCH"))
    y = y + bconv[None, :, None]
    y = jnp.where(y > 0, y, 0.01 * y)
    x_ncw = x_ncw + y
    g = jnp.max(x_ncw, axis=-1)                                   # (N, E)
    logits = g @ wout.T + bout
    return logits.reshape(B, S, L).transpose(0, 2, 1)


def init_params(key, vocab_size, labels_num, embedding_size):
    k1, k2, k3, k4, k5 = jax.random.split(key, 5)
    emb = jax.random.normal(k1, (vocab_size, embedding_size), jnp.float32)
    emb = emb.at[0].set(0.0)                                      # padding_idx=0
    wconv = 0.1 * jax.random.normal(
        k2, (embedding_size, embedding_size, 3), jnp.float32)     # (out, in, K)
    bconv = 0.1 * jax.random.normal(k3, (embedding_size,), jnp.float32)
    wout = 0.1 * jax.random.normal(k4, (labels_num, embedding_size), jnp.float32)
    bout = 0.1 * jax.random.normal(k5, (labels_num,), jnp.float32)
    return {"emb": emb, "wconv": wconv, "bconv": bconv,
            "wout": wout, "bout": bout}


if __name__ == "__main__":
    B, S, T = 2, 8, 16          # batch, max sentence len, max token len
    E, L, V = 32, 12, 40        # embedding size, labels_num, vocab_size

    key = jax.random.PRNGKey(0)
    kp, kt = jax.random.split(key)
    params = init_params(kp, V, L, E)
    tokens = jax.random.randint(kt, (B, S, T), 0, V, dtype=jnp.int32)

    out = single_token_pos_tagger(tokens, params)
    out = jax.block_until_ready(out)
    assert out.shape == (B, L, S), out.shape

    ref = jax.block_until_ready(reference(tokens, params))
    assert jnp.allclose(out, ref, atol=1e-4, rtol=1e-4), float(
        jnp.max(jnp.abs(out - ref)))

    print("KERNEL_OK")
</pallas_src>

<mosaic_0001>
module attributes {stable_mosaic.version = 11 : i64} {
  func.func @_pos_tagger_kernel(%arg0: i32, %arg1: memref<1x1x2048xi32, #tpu.memory_space<vmem>>, %arg2: memref<128x40xf32, #tpu.memory_space<vmem>>, %arg3: memref<16x32xf32, #tpu.memory_space<vmem>>, %arg4: memref<16x128xf32, #tpu.memory_space<vmem>>, %arg5: memref<16x128xf32, #tpu.memory_space<vmem>>) attributes {dimension_semantics = [#tpu.dimension_semantics<parallel>], iteration_bounds = array<i64: 1>, scalar_prefetch = 0 : i64, scratch_operands = 0 : i64, tpu.core_type = #tpu.core_type<tc>, window_params = [{transform_indices = @transform_0, window_bounds = array<i64: 1, 1, 2048>}, {pipeline_mode = #tpu.pipeline_mode<synchronous>, transform_indices = @transform_1, window_bounds = array<i64: 128, 40>}, {pipeline_mode = #tpu.pipeline_mode<synchronous>, transform_indices = @transform_2, window_bounds = array<i64: 16, 32>}, {pipeline_mode = #tpu.pipeline_mode<synchronous>, transform_indices = @transform_3, window_bounds = array<i64: 16, 128>}, {transform_indices = @transform_4, window_bounds = array<i64: 16, 128>}]} {
    %c0 = arith.constant 0 : index
    %c0_0 = arith.constant 0 : index
    %c0_1 = arith.constant 0 : index
    %0 = vector.load %arg1[%c0, %c0_0, %c0_1] : memref<1x1x2048xi32, #tpu.memory_space<vmem>>, vector<1x1x2048xi32>
    %1 = vector.shape_cast %0 : vector<1x1x2048xi32> to vector<1x2048xi32>
    %2 = tpu.iota {dimensions = array<i32: 0>} : vector<40x2048xi32>
    %3 = vector.broadcast %1 : vector<1x2048xi32> to vector<40x2048xi32>
    %4 = arith.cmpi eq, %2, %3 : vector<40x2048xi32>
    %5 = arith.extui %4 : vector<40x2048xi1> to vector<40x2048xi32>
    %6 = arith.sitofp %5 : vector<40x2048xi32> to vector<40x2048xf32>
    %c0_2 = arith.constant 0 : index
    %c0_3 = arith.constant 0 : index
    %7 = vector.load %arg2[%c0_2, %c0_3] : memref<128x40xf32, #tpu.memory_space<vmem>>, vector<128x40xf32>
    %cst = arith.constant dense<0.000000e+00> : vector<128x2048xf32>
    %8 = tpu.matmul %7, %6, %cst {dimension_numbers = #tpu.dot_dimension_numbers<[1], [0], [0], [1], [0, 0, 1, 1], [], []>} : vector<128x40xf32>, vector<40x2048xf32>, vector<128x2048xf32> -> vector<128x2048xf32>
    %9 = vector.extract_strided_slice %8 {offsets = [0, 0], sizes = [32, 2048], strides = [1, 1]} : vector<128x2048xf32> to vector<32x2048xf32>
    %10 = vector.extract_strided_slice %8 {offsets = [32, 0], sizes = [32, 2048], strides = [1, 1]} : vector<128x2048xf32> to vector<32x2048xf32>
    %11 = vector.extract_strided_slice %8 {offsets = [64, 0], sizes = [32, 2048], strides = [1, 1]} : vector<128x2048xf32> to vector<32x2048xf32>
    %12 = vector.extract_strided_slice %8 {offsets = [96, 0], sizes = [32, 2048], strides = [1, 1]} : vector<128x2048xf32> to vector<32x2048xf32>
    %cst_4 = arith.constant 0.000000e+00 : f32
    %13 = vector.broadcast %cst_4 : f32 to vector<32x128xf32>
    %14 = vector.extract_strided_slice %10 {offsets = [0, 0], sizes = [32, 1920], strides = [1, 1]} : vector<32x2048xf32> to vector<32x1920xf32>
    %15 = tpu.concatenate %13, %14 in 1 : vector<32x128xf32>, vector<32x1920xf32> -> vector<32x2048xf32>
    %16 = vector.extract_strided_slice %12 {offsets = [0, 128], sizes = [32, 1920], strides = [1, 1]} : vector<32x2048xf32> to vector<32x1920xf32>
    %17 = tpu.concatenate %16, %13 in 1 : vector<32x1920xf32>, vector<32x128xf32> -> vector<32x2048xf32>
    %18 = arith.addf %15, %11 : vector<32x2048xf32>
    %19 = arith.addf %18, %17 : vector<32x2048xf32>
    %cst_5 = arith.constant 0.000000e+00 : f32
    %20 = vector.broadcast %cst_5 : f32 to vector<32x2048xf32>
    %21 = arith.cmpf ogt, %19, %20 : vector<32x2048xf32>
    %cst_6 = arith.constant 0.00999999977 : f32
    %22 = vector.broadcast %cst_6 : f32 to vector<32x2048xf32>
    %23 = arith.mulf %22, %19 : vector<32x2048xf32>
    %24 = arith.select %21, %19, %23 : vector<32x2048xi1>, vector<32x2048xf32>
    %25 = arith.addf %9, %24 : vector<32x2048xf32>
    %26 = vector.extract_strided_slice %25 {offsets = [0, 0], sizes = [32, 128], strides = [1, 1]} : vector<32x2048xf32> to vector<32x128xf32>
    %27 = vector.extract_strided_slice %25 {offsets = [0, 128], sizes = [32, 128], strides = [1, 1]} : vector<32x2048xf32> to vector<32x128xf32>
    %28 = arith.maximumf %26, %27 : vector<32x128xf32>
    %29 = vector.extract_strided_slice %25 {offsets = [0, 256], sizes = [32, 128], strides = [1, 1]} : vector<32x2048xf32> to vector<32x128xf32>
    %30 = arith.maximumf %28, %29 : vector<32x128xf32>
    %31 = vector.extract_strided_slice %25 {offsets = [0, 384], sizes = [32, 128], strides = [1, 1]} : vector<32x2048xf32> to vector<32x128xf32>
    %32 = arith.maximumf %30, %31 : vector<32x128xf32>
    %33 = vector.extract_strided_slice %25 {offsets = [0, 512], sizes = [32, 128], strides = [1, 1]} : vector<32x2048xf32> to vector<32x128xf32>
    %34 = arith.maximumf %32, %33 : vector<32x128xf32>
    %35 = vector.extract_strided_slice %25 {offsets = [0, 640], sizes = [32, 128], strides = [1, 1]} : vector<32x2048xf32> to vector<32x128xf32>
    %36 = arith.maximumf %34, %35 : vector<32x128xf32>
    %37 = vector.extract_strided_slice %25 {offsets = [0, 768], sizes = [32, 128], strides = [1, 1]} : vector<32x2048xf32> to vector<32x128xf32>
    %38 = arith.maximumf %36, %37 : vector<32x128xf32>
    %39 = vector.extract_strided_slice %25 {offsets = [0, 896], sizes = [32, 128], strides = [1, 1]} : vector<32x2048xf32> to vector<32x128xf32>
    %40 = arith.maximumf %38, %39 : vector<32x128xf32>
    %41 = vector.extract_strided_slice %25 {offsets = [0, 1024], sizes = [32, 128], strides = [1, 1]} : vector<32x2048xf32> to vector<32x128xf32>
    %42 = arith.maximumf %40, %41 : vector<32x128xf32>
    %43 = vector.extract_strided_slice %25 {offsets = [0, 1152], sizes = [32, 128], strides = [1, 1]} : vector<32x2048xf32> to vector<32x128xf32>
    %44 = arith.maximumf %42, %43 : vector<32x128xf32>
    %45 = vector.extract_strided_slice %25 {offsets = [0, 1280], sizes = [32, 128], strides = [1, 1]} : vector<32x2048xf32> to vector<32x128xf32>
    %46 = arith.maximumf %44, %45 : vector<32x128xf32>
    %47 = vector.extract_strided_slice %25 {offsets = [0, 1408], sizes = [32, 128], strides = [1, 1]} : vector<32x2048xf32> to vector<32x128xf32>
    %48 = arith.maximumf %46, %47 : vector<32x128xf32>
    %49 = vector.extract_strided_slice %25 {offsets = [0, 1536], sizes = [32, 128], strides = [1, 1]} : vector<32x2048xf32> to vector<32x128xf32>
    %50 = arith.maximumf %48, %49 : vector<32x128xf32>
    %51 = vector.extract_strided_slice %25 {offsets = [0, 1664], sizes = [32, 128], strides = [1, 1]} : vector<32x2048xf32> to vector<32x128xf32>
    %52 = arith.maximumf %50, %51 : vector<32x128xf32>
    %53 = vector.extract_strided_slice %25 {offsets = [0, 1792], sizes = [32, 128], strides = [1, 1]} : vector<32x2048xf32> to vector<32x128xf32>
    %54 = arith.maximumf %52, %53 : vector<32x128xf32>
    %55 = vector.extract_strided_slice %25 {offsets = [0, 1920], sizes = [32, 128], strides = [1, 1]} : vector<32x2048xf32> to vector<32x128xf32>
    %56 = arith.maximumf %54, %55 : vector<32x128xf32>
    %c0_7 = arith.constant 0 : index
    %c0_8 = arith.constant 0 : index
    %57 = vector.load %arg3[%c0_7, %c0_8] : memref<16x32xf32, #tpu.memory_space<vmem>>, vector<16x32xf32>
    %cst_9 = arith.constant dense<0.000000e+00> : vector<16x128xf32>
    %58 = tpu.matmul %57, %56, %cst_9 {dimension_numbers = #tpu.dot_dimension_numbers<[1], [0], [0], [1], [0, 0, 1, 1], [], []>} : vector<16x32xf32>, vector<32x128xf32>, vector<16x128xf32> -> vector<16x128xf32>
    %c0_10 = arith.constant 0 : index
    %c0_11 = arith.constant 0 : index
    %59 = vector.load %arg4[%c0_10, %c0_11] : memref<16x128xf32, #tpu.memory_space<vmem>>, vector<16x128xf32>
    %60 = arith.addf %58, %59 : vector<16x128xf32>
    %c0_12 = arith.constant 0 : index
    %c0_13 = arith.constant 0 : index
    %61 = vector.load %arg5[%c0_12, %c0_13] : memref<16x128xf32, #tpu.memory_space<vmem>>, vector<16x128xf32>
    tpu.vector_store %arg5[%c0_12, %c0_13], %60 {strides = array<i32>} : memref<16x128xf32, #tpu.memory_space<vmem>>, vector<16x128xf32>,
    return
  }
  func.func @transform_0(%arg0: i32) -> (i32, i32, i32) {
    %c0_i32 = arith.constant 0 : i32
    %c0_i32_0 = arith.constant 0 : i32
    %c0_i32_1 = arith.constant 0 : i32
    return %arg0, %c0_i32, %c0_i32_0 : i32, i32, i32
  }
  func.func @transform_1(%arg0: i32) -> (i32, i32) {
    %c0_i32 = arith.constant 0 : i32
    %c0_i32_0 = arith.constant 0 : i32
    %c0_i32_1 = arith.constant 0 : i32
    return %c0_i32, %c0_i32_0 : i32, i32
  }
  func.func @transform_2(%arg0: i32) -> (i32, i32) {
    %c0_i32 = arith.constant 0 : i32
    %c0_i32_0 = arith.constant 0 : i32
    %c0_i32_1 = arith.constant 0 : i32
    return %c0_i32, %c0_i32_0 : i32, i32
  }
  func.func @transform_3(%arg0: i32) -> (i32, i32) {
    %c0_i32 = arith.constant 0 : i32
    %c0_i32_0 = arith.constant 0 : i32
    %c0_i32_1 = arith.constant 0 : i32
    return %c0_i32, %c0_i32_0 : i32, i32
  }
  func.func @transform_4(%arg0: i32) -> (i32, i32) {
    %c0_i32 = arith.constant 0 : i32
    %c0_i32_0 = arith.constant 0 : i32
    return %c0_i32, %arg0 : i32, i32
  }
}

</mosaic_0001>

<bundles_post_ra>
// kernel: tpu_custom_call.1
= control target key start
LH: loop header
LB: loop body
LE: loop exit
PB: predicated region body
PF: predicated region fallthrough
CT: control target
= control target key end

     0   :  { %v20_v0 = vlaneseq  ;;  %v2632_v1 = vmov 0.0   ;;  %s3858_s0 = inlined_call_operand.vmem [shape: s32[1,1,2048], index: 0, kind: input, shape index: {}]   ;;  %s3859_s1 = inlined_call_operand.vmem [shape: f32[128,40], index: 1, kind: input, shape index: {}]   ;;  %s3860_s2 = inlined_call_operand.vmem [shape: f32[16,32], index: 2, kind: input, shape index: {}]   ;;  %s3861_s3 = inlined_call_operand.vmem [shape: f32[16,128], index: 3, kind: input, shape index: {}]   ;;  %s3862_s4 = inlined_call_operand.hbm [shape: f32[16,128], index: 4, kind: output, shape index: {}]  }
   0x1   :  { %459 = vmatprep.mubr.f32.mxu0 %v2632_v1  ;;  %616 = vmatprep.mubr.f32.mxu1 %v2632_v1  ;;  %v18_v3 = vld [vmem:[%s3858_s0] sm:$0xff] }
   0x2   :  { %v2665_v2 = vshrl.u32 %v20_v0, 7 }
   0x4   :  { %v2671_v4 = vadd.s32 8, %v2665_v2  ;;  %v32_v5 = vsub.s32 1, %v2665_v2  ;;  %v40_v6 = vsub.s32 3, %v2665_v2  ;;  %v28_v7 = vsub.s32 0, %v2665_v2 }
   0x5   :  { %v36_v8 = vsub.s32 2, %v2665_v2  ;;  %v2678_v9 = vadd.s32 16, %v2665_v2  ;;  %v2689_v13 = vadd.s32 24, %v2665_v2 }
   0x6   :  { %v33_v10 = vrot.slane %v18_v3, %v32_v5  ;;  %v41_v11 = vrot.slane %v18_v3, %v40_v6  ;;  %v2686_v12 = vrot.slane %v18_v3, %v28_v7 }
   0x7   :  { %9 = vsyncpa [#allocation3], 0  ;;  %v2693_v14 = vrot.slane %v18_v3, %v36_v8  ;;  %v48_v15 = vsub.s32 5, %v2665_v2  ;;  %v44_v16 = vsub.s32 4, %v2665_v2  ;;  %v2633_v17 = vmov 1.0|1.0  }
   0x8   :  { %vm91_vm0 = vcmp.eq.s32.totalorder %v2665_v2, %v33_v10  ;;  %vm107_vm1 = vcmp.eq.s32.totalorder %v2671_v4, %v33_v10  ;;  %vm93_vm2 = vcmp.eq.s32.totalorder %v2665_v2, %v41_v11  ;;  %vm109_vm3 = vcmp.eq.s32.totalorder %v2671_v4, %v41_v11  ;;  %v2772_v26 = vld [vmem:[%s3859_s1] sm:$0xff]  ;;  %v2812_v30 = vld [vmem:[%s3859_s1 + $0x8] sm:$0xff]  ;;  %v2867_v34 = vld [vmem:[%s3859_s1 + $0x10] sm:$0xff]  ;;  %s2635_s30 = smov [#allocation2]  }
   0x9   :  { %vm2530_vm4 = vmpackc.low %vm107_vm1, %vm91_vm0  ;;  %vm90_vm5 = vcmp.eq.s32.totalorder %v2665_v2, %v2686_v12  ;;  %vm106_vm6 = vcmp.eq.s32.totalorder %v2671_v4, %v2686_v12  ;;  %vm92_vm7 = vcmp.eq.s32.totalorder %v2665_v2, %v2693_v14  ;;  %vm108_vm8 = vcmp.eq.s32.totalorder %v2671_v4, %v2693_v14  ;;  %v2821_v31 = vld [vmem:[%s3858_s0 + $0x8] sm:$0xff]  ;;  %v2899_v36 = vld [vmem:[%s3859_s1 + $0x18] sm:$0xff]  ;;  %s2212_s5 = sshll.u32 %s2635_s30, 4  ;;  %s2213_s5 = int_to_ptr.vmem [resolvable:$true] %s2212_s5 }
   0xa   :  { %2531 = vmatprep.subr.msk.bf16.mxu0 %vm2530_vm4, %v2633_v17  ;;  %vm2538_vm9 = vmpackc.low %vm109_vm3, %vm93_vm2  ;;  %vm123_vm10 = vcmp.eq.s32.totalorder %v2678_v9, %v33_v10  ;;  %vm139_vm11 = vcmp.eq.s32.totalorder %v2689_v13, %v33_v10  ;;  %v2713_v18 = vadd.s32 32, %v2665_v2  ;;  %v56_v19 = vsub.s32 7, %v2665_v2  ;;  %v2920_v37 = vld [vmem:[%s3859_s1 + $0x20] sm:$0xff]  ;;  %v2933_v38 = vld [vmem:[%s3859_s1 + $0x28] sm:$0xff]  ;;  %p2613_p1 = scmp.lt.s32.totalorder %s2213_s5, %s2213_s5 }
   0xb   :  { %2539 = vmatprep.subr.msk.bf16.mxu1 %vm2538_vm9, %v2633_v17  ;;  %vm2532_vm12 = vmpackc.low %vm106_vm6, %vm90_vm5  ;;  %vm125_vm13 = vcmp.eq.s32.totalorder %v2678_v9, %v41_v11  ;;  %vm141_vm14 = vcmp.eq.s32.totalorder %v2689_v13, %v41_v11  ;;  %v52_v20 = vsub.s32 6, %v2665_v2  ;;  %vm122_vm0 = vcmp.eq.s32.totalorder %v2678_v9, %v2686_v12  ;;  %v2944_v39 = vld [vmem:[%s3859_s1 + $0x30] sm:$0xff]  ;;  %v2955_v40 = vld [vmem:[%s3859_s1 + $0x38] sm:$0xff] }
   0xc   :  { %2533 = vmatpush1.bf16.msk.msra.mxu0 %vm2532_vm12, %v2633_v17  ;;  %vm2540_vm15 = vmpackc.low %vm108_vm8, %vm92_vm7  ;;  %vm138_vm1 = vcmp.eq.s32.totalorder %v2689_v13, %v2686_v12  ;;  %vm124_vm3 = vcmp.eq.s32.totalorder %v2678_v9, %v2693_v14  ;;  %vm140_vm4 = vcmp.eq.s32.totalorder %v2689_v13, %v2693_v14  ;;  %v2735_v21 = vrot.slane %v18_v3, %v48_v15  ;;  %v2966_v41 = vld [vmem:[%s3859_s1 + $0x40] sm:$0xff]  ;;  %v2977_v42 = vld [vmem:[%s3859_s1 + $0x48] sm:$0xff] }
   0xd   :  { %2541 = vmatpush1.bf16.msk.msra.mxu1 %vm2540_vm15, %v2633_v17  ;;  %vm2534_vm2 = vmpackc.low %vm139_vm11, %vm123_vm10  ;;  %v2739_v22 = vrot.slane %v18_v3, %v44_v16  ;;  %vm155_vm6 = vcmp.eq.s32.totalorder %v2713_v18, %v33_v10  ;;  %v2745_v23 = vrot.slane %v18_v3, %v56_v19  ;;  %vm157_vm8 = vcmp.eq.s32.totalorder %v2713_v18, %v41_v11  ;;  %v2988_v43 = vld [vmem:[%s3859_s1 + $0x50] sm:$0xff]  ;;  %v2999_v44 = vld [vmem:[%s3859_s1 + $0x58] sm:$0xff] }
   0xe   :  { %2535 = vmatprep.subr.msk.bf16.mxu0 %vm2534_vm2, %v2633_v17  ;;  %vm2542_vm5 = vmpackc.low %vm141_vm14, %vm125_vm13  ;;  %v2751_v24 = vrot.slane %v18_v3, %v52_v20  ;;  %vm95_vm10 = vcmp.eq.s32.totalorder %v2665_v2, %v2735_v21  ;;  %vm111_vm11 = vcmp.eq.s32.totalorder %v2671_v4, %v2735_v21  ;;  %v2634_v25 = vmov 1.0   ;;  %v3010_v45 = vld [vmem:[%s3859_s1 + $0x60] sm:$0xff]  ;;  %v3021_v46 = vld [vmem:[%s3859_s1 + $0x68] sm:$0xff] }
   0xf   :  { %2543 = vmatprep.subr.msk.bf16.mxu1 %vm2542_vm5, %v2633_v17  ;;  %vm2536_vm7 = vmpackc.low %vm138_vm1, %vm122_vm0  ;;  %vm154_vm12 = vcmp.eq.s32.totalorder %v2713_v18, %v2686_v12  ;;  %vm94_vm13 = vcmp.eq.s32.totalorder %v2665_v2, %v2739_v22  ;;  %vm110_vm14 = vcmp.eq.s32.totalorder %v2671_v4, %v2739_v22  ;;  %vm156_vm15 = vcmp.eq.s32.totalorder %v2713_v18, %v2693_v14  ;;  %v3042_v49 = vld [vmem:[%s3859_s1 + $0x70] sm:$0xff]  ;;  %v3059_v52 = vld [vmem:[%s3859_s1 + $0x78] sm:$0xff] }
  0x10   :  { %2537 = vmatpush1.bf16.msk.msra.mxu0 %vm2536_vm7, %v2633_v17  ;;  %vm2544_vm9 = vmpackc.low %vm140_vm4, %vm124_vm3  ;;  %vm346_vm0 = vcmask 326656   ;;  %vm97_vm1 = vcmp.eq.s32.totalorder %v2665_v2, %v2745_v23  ;;  %vm113_vm2 = vcmp.eq.s32.totalorder %v2671_v4, %v2745_v23  ;;  %vm96_vm4 = vcmp.eq.s32.totalorder %v2665_v2, %v2751_v24 }
  0x11   :  { %2545 = vmatpush1.bf16.msk.msra.mxu1 %vm2544_vm9, %v2633_v17  ;;  %2311 = vmatprep.subr.msk.mxu0 %vm155_vm6, %v2634_v25  ;;  %vm2778_vm3 = vmpackc.low %vm111_vm11, %vm95_vm10  ;;  %vm112_vm5 = vcmp.eq.s32.totalorder %v2671_v4, %v2751_v24  ;;  %vm127_vm7 = vcmp.eq.s32.totalorder %v2678_v9, %v2735_v21  ;;  %vm129_vm10 = vcmp.eq.s32.totalorder %v2678_v9, %v2745_v23 }
  0x12   :  { %2337 = vmatprep.subr.msk.mxu1 %vm157_vm8, %v2634_v25  ;;  %vm2787_vm6 = vmpackc.low %vm110_vm14, %vm94_vm13  ;;  %vm143_vm8 = vcmp.eq.s32.totalorder %v2689_v13, %v2735_v21  ;;  %vm145_vm11 = vcmp.eq.s32.totalorder %v2689_v13, %v2745_v23  ;;  %vm126_vm13 = vcmp.eq.s32.totalorder %v2678_v9, %v2739_v22  ;;  %vm142_vm14 = vcmp.eq.s32.totalorder %v2689_v13, %v2739_v22 }
  0x13   :  { %vm2798_vm9 = vmpackc.low %vm113_vm2, %vm97_vm1  ;;  %vm128_vm1 = vcmp.eq.s32.totalorder %v2678_v9, %v2751_v24  ;;  %vm144_vm2 = vcmp.eq.s32.totalorder %v2689_v13, %v2751_v24  ;;  %v2859_v33 = vrot.slane %v2821_v31, %v32_v5  ;;  %v2872_v35 = vrot.slane %v2821_v31, %v40_v6 }
  0x14   :  { %2312 = vmatpush1.msk.msra.mxu0 %vm154_vm12, %v2634_v25  ;;  %vm2556_vm12 = vmpackc.low %vm112_vm5, %vm96_vm4  ;;  %v3029_v47 = vrot.slane %v2821_v31, %v44_v16  ;;  %v3034_v48 = vrot.slane %v2821_v31, %v52_v20  ;;  %v61_v50 = vrot.slane %v2821_v31, %v28_v7  ;;  %v69_v51 = vrot.slane %v2821_v31, %v36_v8 }
  0x15   :  { %2338 = vmatpush1.msk.msra.mxu1 %vm156_vm15, %v2634_v25  ;;  %2313 = vmatmul.mubr.msk.f32.vlgmr.msra.gmra.mrb[0].mxu0 %vm346_vm0, %v2772_v26  ;;  %vm2833_vm15 = vmpackc.low %vm143_vm8, %vm127_vm7  ;;  %vm161_vm7 = vcmp.eq.s32.totalorder %v2713_v18, %v2745_v23  ;;  %vm158_vm8 = vcmp.eq.s32.totalorder %v2713_v18, %v2739_v22  ;;  %v3092_v53 = vrot.slane %v2821_v31, %v48_v15 }
  0x16   :  { %2339 = vmatmul.mubr.msk.f32.vlgmr.msra.gmra.mrb[0].mxu1 %vm346_vm0, %v2772_v26  ;;  %465 = vmatprep.mubr.f32.mxu0 %v2632_v1  ;;  %vm2552_vm4 = vmpackc.low %vm142_vm14, %vm126_vm13  ;;  %vm117_vm13 = vcmp.eq.s32.totalorder %v2671_v4, %v2872_v35  ;;  %v3099_v54 = vrot.slane %v2821_v31, %v56_v19 }
  0x17   :  { %622 = vmatprep.mubr.f32.mxu1 %v2632_v1  ;;  %2547 = vmatprep.subr.msk.bf16.mxu0 %vm2778_vm3, %v2633_v17  ;;  %vm2558_vm3 = vmpackc.low %vm145_vm11, %vm129_vm10  ;;  %vm115_vm10 = vcmp.eq.s32.totalorder %v2671_v4, %v2859_v33  ;;  %vm160_vm11 = vcmp.eq.s32.totalorder %v2713_v18, %v2751_v24 }
  0x18   :  { %2549 = vmatpush1.bf16.msk.msra.mxu0 %vm2787_vm6, %v2633_v17  ;;  %2555 = vmatprep.subr.msk.bf16.mxu1 %vm2798_vm9, %v2633_v17  ;;  %vm2560_vm5 = vmpackc.low %vm144_vm2, %vm128_vm1  ;;  %vm159_vm6 = vcmp.eq.s32.totalorder %v2713_v18, %v2735_v21  ;;  %vm99_vm9 = vcmp.eq.s32.totalorder %v2665_v2, %v2859_v33  ;;  %vm98_vm1 = vcmp.eq.s32.totalorder %v2665_v2, %v61_v50 }
  0x19   :  { %2314 = vmatmul.mubr.msk.f32.gmra.mrb[2].mxu0 %vm346_vm0, %v2812_v30  ;;  %2557 = vmatpush1.bf16.msk.msra.mxu1 %vm2556_vm12, %v2633_v17  ;;  %vm101_vm12 = vcmp.eq.s32.totalorder %v2665_v2, %v2872_v35  ;;  %vm2562_vm14 = vmpackc.low %vm115_vm10, %vm99_vm9  ;;  %vm114_vm2 = vcmp.eq.s32.totalorder %v2671_v4, %v61_v50  ;;  %vm149_vm9 = vcmp.eq.s32.totalorder %v2689_v13, %v2872_v35 }
  0x1a   :  { %2340 = vmatmul.mubr.msk.f32.gmra.mrb[2].mxu1 %vm346_vm0, %v2812_v30  ;;  %471 = vmatprep.mubr.f32.mxu0 %v2632_v1 }
  0x1b   :  { %628 = vmatprep.mubr.f32.mxu1 %v2632_v1  ;;  %2551 = vmatprep.subr.msk.bf16.mxu0 %vm2833_vm15, %v2633_v17  ;;  %vm2570_vm15 = vmpackc.low %vm117_vm13, %vm101_vm12  ;;  %vm130_vm12 = vcmp.eq.s32.totalorder %v2678_v9, %v61_v50  ;;  %vm146_vm13 = vcmp.eq.s32.totalorder %v2689_v13, %v61_v50 }
  0x1c   :  { %2559 = vmatprep.subr.msk.bf16.mxu1 %vm2558_vm3, %v2633_v17  ;;  %2553 = vmatpush1.bf16.msk.msra.mxu0 %vm2552_vm4, %v2633_v17  ;;  %vm100_vm3 = vcmp.eq.s32.totalorder %v2665_v2, %v69_v51  ;;  %vm116_vm4 = vcmp.eq.s32.totalorder %v2671_v4, %v69_v51 }
  0x1d   :  { %2315 = vmatmul.mubr.msk.f32.gmra.mrb[4].mxu0 %vm346_vm0, %v2867_v34  ;;  %2561 = vmatpush1.bf16.msk.msra.mxu1 %vm2560_vm5, %v2633_v17  ;;  %vm131_vm5 = vcmp.eq.s32.totalorder %v2678_v9, %v2859_v33  ;;  %vm2572_vm10 = vmpackc.low %vm116_vm4, %vm100_vm3  ;;  %vm163_vm4 = vcmp.eq.s32.totalorder %v2713_v18, %v2859_v33 }
  0x1e   :  { %2341 = vmatmul.mubr.msk.f32.gmra.mrb[4].mxu1 %vm346_vm0, %v2867_v34  ;;  %477 = vmatprep.mubr.f32.mxu0 %v2632_v1 }
  0x1f   :  { %634 = vmatprep.mubr.f32.mxu1 %v2632_v1  ;;  %2363 = vmatprep.subr.msk.mxu0 %vm159_vm6, %v2634_v25  ;;  %vm147_vm6 = vcmp.eq.s32.totalorder %v2689_v13, %v2859_v33 }
  0x20   :  { %2389 = vmatprep.subr.msk.mxu1 %vm161_vm7, %v2634_v25  ;;  %2364 = vmatpush1.msk.msra.mxu0 %vm158_vm8, %v2634_v25  ;;  %vm2564_vm7 = vmpackc.low %vm114_vm2, %vm98_vm1  ;;  %vm133_vm8 = vcmp.eq.s32.totalorder %v2678_v9, %v2872_v35  ;;  %vm148_vm1 = vcmp.eq.s32.totalorder %v2689_v13, %v69_v51 }
  0x21   :  { %2316 = vmatmul.mubr.msk.f32.gmra.mrb[6].mxu0 %vm346_vm0, %v2899_v36  ;;  %2390 = vmatpush1.msk.msra.mxu1 %vm160_vm11, %v2634_v25  ;;  %vm2566_vm11 = vmpackc.low %vm147_vm6, %vm131_vm5  ;;  %vm165_vm5 = vcmp.eq.s32.totalorder %v2713_v18, %v2872_v35  ;;  %vm103_vm6 = vcmp.eq.s32.totalorder %v2665_v2, %v3092_v53 }
  0x22   :  { %2342 = vmatmul.mubr.msk.f32.gmra.mrb[6].mxu1 %vm346_vm0, %v2899_v36  ;;  %483 = vmatprep.mubr.f32.mxu0 %v2632_v1  ;;  %vm2568_vm2 = vmpackc.low %vm146_vm13, %vm130_vm12 }
  0x23   :  { %640 = vmatprep.mubr.f32.mxu1 %v2632_v1  ;;  %2563 = vmatprep.subr.msk.bf16.mxu0 %vm2562_vm14, %v2633_v17  ;;  %vm2574_vm14 = vmpackc.low %vm149_vm9, %vm133_vm8  ;;  %vm105_vm8 = vcmp.eq.s32.totalorder %v2665_v2, %v3099_v54  ;;  %vm121_vm9 = vcmp.eq.s32.totalorder %v2671_v4, %v3099_v54 }
  0x24   :  { %2571 = vmatprep.subr.msk.bf16.mxu1 %vm2570_vm15, %v2633_v17  ;;  %vm132_vm15 = vcmp.eq.s32.totalorder %v2678_v9, %v69_v51  ;;  %vm2586_vm13 = vmpackc.low %vm121_vm9, %vm105_vm8 }
  0x25   :  { %2317 = vmatmul.mubr.msk.f32.gmra.mrb[8].mxu0 %vm346_vm0, %v2920_v37  ;;  %vm2576_vm3 = vmpackc.low %vm148_vm1, %vm132_vm15  ;;  %vm118_vm15 = vcmp.eq.s32.totalorder %v2671_v4, %v3029_v47  ;;  %vm104_vm1 = vcmp.eq.s32.totalorder %v2665_v2, %v3034_v48 }
  0x26   :  { %2343 = vmatmul.mubr.msk.f32.gmra.mrb[8].mxu1 %vm346_vm0, %v2920_v37  ;;  %489 = vmatprep.mubr.f32.mxu0 %v2632_v1 }
  0x27   :  { %646 = vmatprep.mubr.f32.mxu1 %v2632_v1 }
  0x29   :  { %2318 = vmatmul.mubr.msk.f32.gmra.mrb[10].mxu0 %vm346_vm0, %v2933_v38 }
  0x2a   :  { %2344 = vmatmul.mubr.msk.f32.gmra.mrb[10].mxu1 %vm346_vm0, %v2933_v38  ;;  %495 = vmatprep.mubr.f32.mxu0 %v2632_v1 }
  0x2b   :  { %652 = vmatprep.mubr.f32.mxu1 %v2632_v1 }
  0x2d   :  { %2319 = vmatmul.mubr.msk.f32.gmra.mrb[12].mxu0 %vm346_vm0, %v2944_v39 }
  0x2e   :  { %2345 = vmatmul.mubr.msk.f32.gmra.mrb[12].mxu1 %vm346_vm0, %v2944_v39  ;;  %501 = vmatprep.mubr.f32.mxu0 %v2632_v1 }
  0x2f   :  { %658 = vmatprep.mubr.f32.mxu1 %v2632_v1 }
  0x31   :  { %2320 = vmatmul.mubr.msk.f32.gmra.mrb[14].mxu0 %vm346_vm0, %v2955_v40 }
  0x32   :  { %2346 = vmatmul.mubr.msk.f32.gmra.mrb[14].mxu1 %vm346_vm0, %v2955_v40  ;;  %507 = vmatprep.mubr.f32.mxu0 %v2632_v1 }
  0x33   :  { %664 = vmatprep.mubr.f32.mxu1 %v2632_v1 }
  0x35   :  { %2321 = vmatmul.mubr.msk.f32.gmra.mrb[16].mxu0 %vm346_vm0, %v2966_v41 }
  0x36   :  { %2347 = vmatmul.mubr.msk.f32.gmra.mrb[16].mxu1 %vm346_vm0, %v2966_v41  ;;  %513 = vmatprep.mubr.f32.mxu0 %v2632_v1 }
  0x37   :  { %670 = vmatprep.mubr.f32.mxu1 %v2632_v1 }
  0x39   :  { %2322 = vmatmul.mubr.msk.f32.gmra.mrb[18].mxu0 %vm346_vm0, %v2977_v42 }
  0x3a   :  { %2348 = vmatmul.mubr.msk.f32.gmra.mrb[18].mxu1 %vm346_vm0, %v2977_v42  ;;  %519 = vmatprep.mubr.f32.mxu0 %v2632_v1 }
  0x3b   :  { %676 = vmatprep.mubr.f32.mxu1 %v2632_v1 }
  0x3d   :  { %2323 = vmatmul.mubr.msk.f32.gmra.mrb[20].mxu0 %vm346_vm0, %v2988_v43 }
  0x3e   :  { %2349 = vmatmul.mubr.msk.f32.gmra.mrb[20].mxu1 %vm346_vm0, %v2988_v43  ;;  %525 = vmatprep.mubr.f32.mxu0 %v2632_v1 }
  0x3f   :  { %682 = vmatprep.mubr.f32.mxu1 %v2632_v1 }
  0x41   :  { %2324 = vmatmul.mubr.msk.f32.gmra.mrb[22].mxu0 %vm346_vm0, %v2999_v44 }
  0x42   :  { %2350 = vmatmul.mubr.msk.f32.gmra.mrb[22].mxu1 %vm346_vm0, %v2999_v44  ;;  %531 = vmatprep.mubr.f32.mxu0 %v2632_v1 }
  0x43   :  { %688 = vmatprep.mubr.f32.mxu1 %v2632_v1 }
  0x45   :  { %2325 = vmatmul.mubr.msk.f32.gmra.mrb[24].mxu0 %vm346_vm0, %v3010_v45 }
  0x46   :  { %2351 = vmatmul.mubr.msk.f32.gmra.mrb[24].mxu1 %vm346_vm0, %v3010_v45  ;;  %536 = vmatprep.mubr.f32.mxu0 %v2632_v1 }
  0x47   :  { %694 = vmatprep.mubr.f32.mxu1 %v2632_v1 }
  0x49   :  { %2326 = vmatmul.mubr.msk.f32.gmra.mrb[26].mxu0 %vm346_vm0, %v3021_v46 }
  0x4a   :  { %2352 = vmatmul.mubr.msk.f32.gmra.mrb[26].mxu1 %vm346_vm0, %v3021_v46  ;;  %541 = vmatprep.mubr.f32.mxu0 %v2632_v1 }
  0x4b   :  { %700 = vmatprep.mubr.f32.mxu1 %v2632_v1 }
  0x4d   :  { %2327 = vmatmul.mubr.msk.f32.gmra.mrb[28].mxu0 %vm346_vm0, %v3042_v49 }
  0x4e   :  { %2353 = vmatmul.mubr.msk.f32.gmra.mrb[28].mxu1 %vm346_vm0, %v3042_v49  ;;  %546 = vmatprep.mubr.f32.mxu0 %v2632_v1 }
  0x4f   :  { %706 = vmatprep.mubr.f32.mxu1 %v2632_v1 }
  0x51   :  { %2328 = vmatmul.mubr.msk.f32.gmra.mrb[30].mxu0 %vm346_vm0, %v3059_v52 }
  0x52   :  { %2354 = vmatmul.mubr.msk.f32.gmra.mrb[30].mxu1 %vm346_vm0, %v3059_v52  ;;  %777 = vmatprep.mubr.f32.mxu0 %v2632_v1 }
  0x53   :  { %938 = vmatprep.mubr.f32.mxu1 %v2632_v1 }
  0x55   :  { %2365 = vmatmul.mubr.msk.f32.vlgmr.msra.gmra.mrb[32].mxu0 %vm346_vm0, %v2772_v26 }
  0x56   :  { %2391 = vmatmul.mubr.msk.f32.vlgmr.msra.gmra.mrb[32].mxu1 %vm346_vm0, %v2772_v26  ;;  %783 = vmatprep.mubr.f32.mxu0 %v2632_v1 }
  0x57   :  { %944 = vmatprep.mubr.f32.mxu1 %v2632_v1  ;;  %2565 = vmatpush1.bf16.msk.msra.mxu0 %vm2564_vm7, %v2633_v17  ;;  %vm119_vm7 = vcmp.eq.s32.totalorder %v2671_v4, %v3092_v53 }
  0x58   :  { %2573 = vmatpush1.bf16.msk.msra.mxu1 %vm2572_vm10, %v2633_v17  ;;  %2567 = vmatprep.subr.msk.bf16.mxu0 %vm2566_vm11, %v2633_v17  ;;  %vm162_vm10 = vcmp.eq.s32.totalorder %v2713_v18, %v61_v50  ;;  %vm164_vm11 = vcmp.eq.s32.totalorder %v2713_v18, %v69_v51  ;;  %vm2578_vm12 = vmpackc.low %vm119_vm7, %vm103_vm6  ;;  %vm137_vm6 = vcmp.eq.s32.totalorder %v2678_v9, %v3099_v54 }
  0x59   :  { %2366 = vmatmul.mubr.msk.f32.gmra.mrb[34].mxu0 %vm346_vm0, %v2812_v30  ;;  %2575 = vmatprep.subr.msk.bf16.mxu1 %vm2574_vm14, %v2633_v17  ;;  %vm102_vm14 = vcmp.eq.s32.totalorder %v2665_v2, %v3029_v47  ;;  %vm153_vm7 = vcmp.eq.s32.totalorder %v2689_v13, %v3099_v54 }
  0x5a   :  { %2392 = vmatmul.mubr.msk.f32.gmra.mrb[34].mxu1 %vm346_vm0, %v2812_v30  ;;  %789 = vmatprep.mubr.f32.mxu0 %v2632_v1 }
  0x5b   :  { %950 = vmatprep.mubr.f32.mxu1 %v2632_v1  ;;  %2569 = vmatpush1.bf16.msk.msra.mxu0 %vm2568_vm2, %v2633_v17  ;;  %vm120_vm2 = vcmp.eq.s32.totalorder %v2671_v4, %v3034_v48 }
  0x5c   :  { %2577 = vmatpush1.bf16.msk.msra.mxu1 %vm2576_vm3, %v2633_v17  ;;  %2415 = vmatprep.subr.msk.mxu0 %vm163_vm4, %v2634_v25  ;;  %vm135_vm3 = vcmp.eq.s32.totalorder %v2678_v9, %v3092_v53  ;;  %vm151_vm4 = vcmp.eq.s32.totalorder %v2689_v13, %v3092_v53  ;;  %vm2588_vm8 = vmpackc.low %vm120_vm2, %vm104_vm1  ;;  %vm167_vm2 = vcmp.eq.s32.totalorder %v2713_v18, %v3092_v53 }
  0x5d   :  { %2367 = vmatmul.mubr.msk.f32.gmra.mrb[36].mxu0 %vm346_vm0, %v2867_v34  ;;  %2441 = vmatprep.subr.msk.mxu1 %vm165_vm5, %v2634_v25  ;;  %vm2580_vm5 = vmpackc.low %vm118_vm15, %vm102_vm14  ;;  %vm152_vm14 = vcmp.eq.s32.totalorder %v2689_v13, %v3034_v48 }
  0x5e   :  { %2393 = vmatmul.mubr.msk.f32.gmra.mrb[36].mxu1 %vm346_vm0, %v2867_v34  ;;  %795 = vmatprep.mubr.f32.mxu0 %v2632_v1  ;;  %vm2582_vm9 = vmpackc.low %vm151_vm4, %vm135_vm3  ;;  %vm169_vm3 = vcmp.eq.s32.totalorder %v2713_v18, %v3099_v54  ;;  %vm166_vm4 = vcmp.eq.s32.totalorder %v2713_v18, %v3029_v47 }
  0x5f   :  { %956 = vmatprep.mubr.f32.mxu1 %v2632_v1  ;;  %2416 = vmatpush1.msk.msra.mxu0 %vm162_vm10, %v2634_v25  ;;  %vm134_vm10 = vcmp.eq.s32.totalorder %v2678_v9, %v3029_v47 }
  0x60   :  { %2442 = vmatpush1.msk.msra.mxu1 %vm164_vm11, %v2634_v25  ;;  %2579 = vmatprep.subr.msk.bf16.mxu0 %vm2578_vm12, %v2633_v17  ;;  %vm150_vm11 = vcmp.eq.s32.totalorder %v2689_v13, %v3029_v47  ;;  %vm2590_vm12 = vmpackc.low %vm153_vm7, %vm137_vm6 }
  0x61   :  { %2368 = vmatmul.mubr.msk.f32.gmra.mrb[38].mxu0 %vm346_vm0, %v2899_v36  ;;  %2587 = vmatprep.subr.msk.bf16.mxu1 %vm2586_vm13, %v2633_v17  ;;  %vm136_vm13 = vcmp.eq.s32.totalorder %v2678_v9, %v3034_v48  ;;  %vm2584_vm15 = vmpackc.low %vm150_vm11, %vm134_vm10 }
  0x62   :  { %2394 = vmatmul.mubr.msk.f32.gmra.mrb[38].mxu1 %vm346_vm0, %v2899_v36  ;;  %801 = vmatprep.mubr.f32.mxu0 %v2632_v1  ;;  %vm2592_vm1 = vmpackc.low %vm152_vm14, %vm136_vm13 }
  0x63   :  { %962 = vmatprep.mubr.f32.mxu1 %v2632_v1 }
  0x65   :  { %2369 = vmatmul.mubr.msk.f32.gmra.mrb[40].mxu0 %vm346_vm0, %v2920_v37 }
  0x66   :  { %2395 = vmatmul.mubr.msk.f32.gmra.mrb[40].mxu1 %vm346_vm0, %v2920_v37  ;;  %807 = vmatprep.mubr.f32.mxu0 %v2632_v1 }
  0x67   :  { %968 = vmatprep.mubr.f32.mxu1 %v2632_v1 }
  0x69   :  { %2370 = vmatmul.mubr.msk.f32.gmra.mrb[42].mxu0 %vm346_vm0, %v2933_v38 }
  0x6a   :  { %2396 = vmatmul.mubr.msk.f32.gmra.mrb[42].mxu1 %vm346_vm0, %v2933_v38  ;;  %813 = vmatprep.mubr.f32.mxu0 %v2632_v1 }
  0x6b   :  { %974 = vmatprep.mubr.f32.mxu1 %v2632_v1 }
  0x6d   :  { %2371 = vmatmul.mubr.msk.f32.gmra.mrb[44].mxu0 %vm346_vm0, %v2944_v39 }
  0x6e   :  { %2397 = vmatmul.mubr.msk.f32.gmra.mrb[44].mxu1 %vm346_vm0, %v2944_v39  ;;  %819 = vmatprep.mubr.f32.mxu0 %v2632_v1 }
  0x6f   :  { %980 = vmatprep.mubr.f32.mxu1 %v2632_v1 }
  0x71   :  { %2372 = vmatmul.mubr.msk.f32.gmra.mrb[46].mxu0 %vm346_vm0, %v2955_v40 }
  0x72   :  { %2398 = vmatmul.mubr.msk.f32.gmra.mrb[46].mxu1 %vm346_vm0, %v2955_v40  ;;  %825 = vmatprep.mubr.f32.mxu0 %v2632_v1 }
  0x73   :  { %986 = vmatprep.mubr.f32.mxu1 %v2632_v1 }
  0x75   :  { %2373 = vmatmul.mubr.msk.f32.gmra.mrb[48].mxu0 %vm346_vm0, %v2966_v41 }
  0x76   :  { %2399 = vmatmul.mubr.msk.f32.gmra.mrb[48].mxu1 %vm346_vm0, %v2966_v41  ;;  %831 = vmatprep.mubr.f32.mxu0 %v2632_v1 }
  0x77   :  { %992 = vmatprep.mubr.f32.mxu1 %v2632_v1 }
  0x79   :  { %2374 = vmatmul.mubr.msk.f32.gmra.mrb[50].mxu0 %vm346_vm0, %v2977_v42 }
  0x7a   :  { %2400 = vmatmul.mubr.msk.f32.gmra.mrb[50].mxu1 %vm346_vm0, %v2977_v42  ;;  %837 = vmatprep.mubr.f32.mxu0 %v2632_v1 }
  0x7b   :  { %998 = vmatprep.mubr.f32.mxu1 %v2632_v1 }
  0x7d   :  { %2375 = vmatmul.mubr.msk.f32.gmra.mrb[52].mxu0 %vm346_vm0, %v2988_v43 }
  0x7e   :  { %2401 = vmatmul.mubr.msk.f32.gmra.mrb[52].mxu1 %vm346_vm0, %v2988_v43  ;;  %843 = vmatprep.mubr.f32.mxu0 %v2632_v1 }
  0x7f   :  { %1004 = vmatprep.mubr.f32.mxu1 %v2632_v1 }
  0x81   :  { %2376 = vmatmul.mubr.msk.f32.gmra.mrb[54].mxu0 %vm346_vm0, %v2999_v44 }
  0x82   :  { %2402 = vmatmul.mubr.msk.f32.gmra.mrb[54].mxu1 %vm346_vm0, %v2999_v44  ;;  %849 = vmatprep.mubr.f32.mxu0 %v2632_v1 }
  0x83   :  { %1010 = vmatprep.mubr.f32.mxu1 %v2632_v1 }
  0x85   :  { %2377 = vmatmul.mubr.msk.f32.gmra.mrb[56].mxu0 %vm346_vm0, %v3010_v45 }
  0x86   :  { %2403 = vmatmul.mubr.msk.f32.gmra.mrb[56].mxu1 %vm346_vm0, %v3010_v45  ;;  %855 = vmatprep.mubr.f32.mxu0 %v2632_v1 }
  0x87   :  { %1016 = vmatprep.mubr.f32.mxu1 %v2632_v1 }
  0x89   :  { %2378 = vmatmul.mubr.msk.f32.gmra.mrb[58].mxu0 %vm346_vm0, %v3021_v46 }
  0x8a   :  { %2404 = vmatmul.mubr.msk.f32.gmra.mrb[58].mxu1 %vm346_vm0, %v3021_v46  ;;  %861 = vmatprep.mubr.f32.mxu0 %v2632_v1 }
  0x8b   :  { %1022 = vmatprep.mubr.f32.mxu1 %v2632_v1 }
  0x8d   :  { %2379 = vmatmul.mubr.msk.f32.gmra.mrb[60].mxu0 %vm346_vm0, %v3042_v49 }
  0x8e   :  { %2405 = vmatmul.mubr.msk.f32.gmra.mrb[60].mxu1 %vm346_vm0, %v3042_v49  ;;  %867 = vmatprep.mubr.f32.mxu0 %v2632_v1 }
  0x8f   :  { %1028 = vmatprep.mubr.f32.mxu1 %v2632_v1 }
  0x91   :  { %2380 = vmatmul.mubr.msk.f32.gmra.mrb[62].mxu0 %vm346_vm0, %v3059_v52 }
  0x92   :  { %2406 = vmatmul.mubr.msk.f32.gmra.mrb[62].mxu1 %vm346_vm0, %v3059_v52  ;;  %1099 = vmatprep.mubr.f32.mxu0 %v2632_v1 }
  0x93   :  { %1260 = vmatprep.mubr.f32.mxu1 %v2632_v1 }
  0x95   :  { %2417 = vmatmul.mubr.msk.f32.vlgmr.msra.gmra.mrb[64].mxu0 %vm346_vm0, %v2772_v26 }
  0x96   :  { %2443 = vmatmul.mubr.msk.f32.vlgmr.msra.gmra.mrb[64].mxu1 %vm346_vm0, %v2772_v26  ;;  %1105 = vmatprep.mubr.f32.mxu0 %v2632_v1 }
  0x97   :  { %1266 = vmatprep.mubr.f32.mxu1 %v2632_v1  ;;  %2581 = vmatpush1.bf16.msk.msra.mxu0 %vm2580_vm5, %v2633_v17  ;;  %vm168_vm5 = vcmp.eq.s32.totalorder %v2713_v18, %v3034_v48 }
  0x98   :  { %2589 = vmatpush1.bf16.msk.msra.mxu1 %vm2588_vm8, %v2633_v17  ;;  %2583 = vmatprep.subr.msk.bf16.mxu0 %vm2582_vm9, %v2633_v17 }
  0x99   :  { %2418 = vmatmul.mubr.msk.f32.gmra.mrb[66].mxu0 %vm346_vm0, %v2812_v30  ;;  %2591 = vmatprep.subr.msk.bf16.mxu1 %vm2590_vm12, %v2633_v17 }
  0x9a   :  { %2444 = vmatmul.mubr.msk.f32.gmra.mrb[66].mxu1 %vm346_vm0, %v2812_v30  ;;  %1111 = vmatprep.mubr.f32.mxu0 %v2632_v1 }
  0x9b   :  { %1272 = vmatprep.mubr.f32.mxu1 %v2632_v1  ;;  %2585 = vmatpush1.bf16.msk.msra.mxu0 %vm2584_vm15, %v2633_v17 }
  0x9c   :  { %2593 = vmatpush1.bf16.msk.msra.mxu1 %vm2592_vm1, %v2633_v17  ;;  %2467 = vmatprep.subr.msk.mxu0 %vm167_vm2, %v2634_v25 }
  0x9d   :  { %2419 = vmatmul.mubr.msk.f32.gmra.mrb[68].mxu0 %vm346_vm0, %v2867_v34  ;;  %2493 = vmatprep.subr.msk.mxu1 %vm169_vm3, %v2634_v25 }
  0x9e   :  { %2445 = vmatmul.mubr.msk.f32.gmra.mrb[68].mxu1 %vm346_vm0, %v2867_v34  ;;  %1117 = vmatprep.mubr.f32.mxu0 %v2632_v1 }
  0x9f   :  { %1278 = vmatprep.mubr.f32.mxu1 %v2632_v1  ;;  %2468 = vmatpush1.msk.msra.mxu0 %vm166_vm4, %v2634_v25 }
  0xa0   :  { %2494 = vmatpush1.msk.msra.mxu1 %vm168_vm5, %v2634_v25 }
  0xa1   :  { %2420 = vmatmul.mubr.msk.f32.gmra.mrb[70].mxu0 %vm346_vm0, %v2899_v36 }
  0xa2   :  { %2446 = vmatmul.mubr.msk.f32.gmra.mrb[70].mxu1 %vm346_vm0, %v2899_v36  ;;  %1123 = vmatprep.mubr.f32.mxu0 %v2632_v1 }
  0xa3   :  { %1284 = vmatprep.mubr.f32.mxu1 %v2632_v1 }
  0xa5   :  { %2421 = vmatmul.mubr.msk.f32.gmra.mrb[72].mxu0 %vm346_vm0, %v2920_v37 }
  0xa6   :  { %2447 = vmatmul.mubr.msk.f32.gmra.mrb[72].mxu1 %vm346_vm0, %v2920_v37  ;;  %1129 = vmatprep.mubr.f32.mxu0 %v2632_v1 }
  0xa7   :  { %1290 = vmatprep.mubr.f32.mxu1 %v2632_v1 }
  0xa9   :  { %2422 = vmatmul.mubr.msk.f32.gmra.mrb[74].mxu0 %vm346_vm0, %v2933_v38 }
  0xaa   :  { %2448 = vmatmul.mubr.msk.f32.gmra.mrb[74].mxu1 %vm346_vm0, %v2933_v38  ;;  %1135 = vmatprep.mubr.f32.mxu0 %v2632_v1 }
  0xab   :  { %1296 = vmatprep.mubr.f32.mxu1 %v2632_v1 }
  0xad   :  { %2423 = vmatmul.mubr.msk.f32.gmra.mrb[76].mxu0 %vm346_vm0, %v2944_v39 }
  0xae   :  { %2449 = vmatmul.mubr.msk.f32.gmra.mrb[76].mxu1 %vm346_vm0, %v2944_v39  ;;  %1141 = vmatprep.mubr.f32.mxu0 %v2632_v1 }
  0xaf   :  { %1302 = vmatprep.mubr.f32.mxu1 %v2632_v1 }
  0xb1   :  { %2424 = vmatmul.mubr.msk.f32.gmra.mrb[78].mxu0 %vm346_vm0, %v2955_v40 }
  0xb2   :  { %2450 = vmatmul.mubr.msk.f32.gmra.mrb[78].mxu1 %vm346_vm0, %v2955_v40  ;;  %1147 = vmatprep.mubr.f32.mxu0 %v2632_v1 }
  0xb3   :  { %1308 = vmatprep.mubr.f32.mxu1 %v2632_v1 }
  0xb5   :  { %2425 = vmatmul.mubr.msk.f32.gmra.mrb[80].mxu0 %vm346_vm0, %v2966_v41 }
  0xb6   :  { %2451 = vmatmul.mubr.msk.f32.gmra.mrb[80].mxu1 %vm346_vm0, %v2966_v41  ;;  %1153 = vmatprep.mubr.f32.mxu0 %v2632_v1 }
  0xb7   :  { %1314 = vmatprep.mubr.f32.mxu1 %v2632_v1 }
  0xb9   :  { %2426 = vmatmul.mubr.msk.f32.gmra.mrb[82].mxu0 %vm346_vm0, %v2977_v42 }
  0xba   :  { %2452 = vmatmul.mubr.msk.f32.gmra.mrb[82].mxu1 %vm346_vm0, %v2977_v42  ;;  %1159 = vmatprep.mubr.f32.mxu0 %v2632_v1 }
  0xbb   :  { %1320 = vmatprep.mubr.f32.mxu1 %v2632_v1 }
  0xbd   :  { %2427 = vmatmul.mubr.msk.f32.gmra.mrb[84].mxu0 %vm346_vm0, %v2988_v43 }
  0xbe   :  { %2453 = vmatmul.mubr.msk.f32.gmra.mrb[84].mxu1 %vm346_vm0, %v2988_v43  ;;  %1165 = vmatprep.mubr.f32.mxu0 %v2632_v1 }
  0xbf   :  { %1326 = vmatprep.mubr.f32.mxu1 %v2632_v1 }
  0xc1   :  { %2428 = vmatmul.mubr.msk.f32.gmra.mrb[86].mxu0 %vm346_vm0, %v2999_v44 }
  0xc2   :  { %2454 = vmatmul.mubr.msk.f32.gmra.mrb[86].mxu1 %vm346_vm0, %v2999_v44  ;;  %1171 = vmatprep.mubr.f32.mxu0 %v2632_v1 }
  0xc3   :  { %1332 = vmatprep.mubr.f32.mxu1 %v2632_v1 }
  0xc5   :  { %2429 = vmatmul.mubr.msk.f32.gmra.mrb[88].mxu0 %vm346_vm0, %v3010_v45 }
  0xc6   :  { %2455 = vmatmul.mubr.msk.f32.gmra.mrb[88].mxu1 %vm346_vm0, %v3010_v45  ;;  %1177 = vmatprep.mubr.f32.mxu0 %v2632_v1 }
  0xc7   :  { %1338 = vmatprep.mubr.f32.mxu1 %v2632_v1 }
  0xc9   :  { %2430 = vmatmul.mubr.msk.f32.gmra.mrb[90].mxu0 %vm346_vm0, %v3021_v46 }
  0xca   :  { %2456 = vmatmul.mubr.msk.f32.gmra.mrb[90].mxu1 %vm346_vm0, %v3021_v46  ;;  %1183 = vmatprep.mubr.f32.mxu0 %v2632_v1 }
  0xcb   :  { %1344 = vmatprep.mubr.f32.mxu1 %v2632_v1 }
  0xcd   :  { %2431 = vmatmul.mubr.msk.f32.gmra.mrb[92].mxu0 %vm346_vm0, %v3042_v49 }
  0xce   :  { %2457 = vmatmul.mubr.msk.f32.gmra.mrb[92].mxu1 %vm346_vm0, %v3042_v49  ;;  %1189 = vmatprep.mubr.f32.mxu0 %v2632_v1 }
  0xcf   :  { %1350 = vmatprep.mubr.f32.mxu1 %v2632_v1 }
  0xd1   :  { %2432 = vmatmul.mubr.msk.f32.gmra.mrb[94].mxu0 %vm346_vm0, %v3059_v52 }
  0xd2   :  { %2458 = vmatmul.mubr.msk.f32.gmra.mrb[94].mxu1 %vm346_vm0, %v3059_v52  ;;  %1421 = vmatprep.mubr.f32.mxu0 %v2632_v1 }
  0xd3   :  { %1582 = vmatprep.mubr.f32.mxu1 %v2632_v1 }
  0xd5   :  { %2469 = vmatmul.mubr.msk.f32.vlgmr.msra.gmra.mrb[96].mxu0 %vm346_vm0, %v2772_v26 }
  0xd6   :  { %2495 = vmatmul.mubr.msk.f32.vlgmr.msra.gmra.mrb[96].mxu1 %vm346_vm0, %v2772_v26  ;;  %1427 = vmatprep.mubr.f32.mxu0 %v2632_v1 }
  0xd7   :  { %1588 = vmatprep.mubr.f32.mxu1 %v2632_v1 }
  0xd9   :  { %2470 = vmatmul.mubr.msk.f32.gmra.mrb[98].mxu0 %vm346_vm0, %v2812_v30 }
  0xda   :  { %2496 = vmatmul.mubr.msk.f32.gmra.mrb[98].mxu1 %vm346_vm0, %v2812_v30  ;;  %1433 = vmatprep.mubr.f32.mxu0 %v2632_v1 }
  0xdb   :  { %1594 = vmatprep.mubr.f32.mxu1 %v2632_v1 }
  0xdd   :  { %2471 = vmatmul.mubr.msk.f32.gmra.mrb[100].mxu0 %vm346_vm0, %v2867_v34 }
  0xde   :  { %2497 = vmatmul.mubr.msk.f32.gmra.mrb[100].mxu1 %vm346_vm0, %v2867_v34  ;;  %1439 = vmatprep.mubr.f32.mxu0 %v2632_v1 }
  0xdf   :  { %1600 = vmatprep.mubr.f32.mxu1 %v2632_v1 }
  0xe1   :  { %2472 = vmatmul.mubr.msk.f32.gmra.mrb[102].mxu0 %vm346_vm0, %v2899_v36 }
  0xe2   :  { %2498 = vmatmul.mubr.msk.f32.gmra.mrb[102].mxu1 %vm346_vm0, %v2899_v36  ;;  %1445 = vmatprep.mubr.f32.mxu0 %v2632_v1 }
  0xe3   :  { %1606 = vmatprep.mubr.f32.mxu1 %v2632_v1 }
  0xe5   :  { %2473 = vmatmul.mubr.msk.f32.gmra.mrb[104].mxu0 %vm346_vm0, %v2920_v37 }
  0xe6   :  { %2499 = vmatmul.mubr.msk.f32.gmra.mrb[104].mxu1 %vm346_vm0, %v2920_v37  ;;  %1451 = vmatprep.mubr.f32.mxu0 %v2632_v1 }
  0xe7   :  { %1611 = vmatprep.mubr.f32.mxu1 %v2632_v1 }
  0xe8   :  { %v3384_v55 = vpop.f32.mrb[0].mxu0 }
  0xe9   :  { %v3386_v56 = vpop.f32.mrb[1].mxu0  ;;  %2474 = vmatmul.mubr.msk.f32.gmra.mrb[106].mxu0 %vm346_vm0, %v2933_v38  ;;  %v3390_v57 = vpop.f32.mrb[0].mxu1 }
  0xea   :  { %2500 = vmatmul.mubr.msk.f32.gmra.mrb[106].mxu1 %vm346_vm0, %v2933_v38  ;;  %v3394_v58 = vpop.f32.mrb[1].mxu1  ;;  %1457 = vmatprep.mubr.f32.mxu0 %v2632_v1 }
  0xeb   :  { %1616 = vmatprep.mubr.f32.mxu1 %v2632_v1 }
  0xec   :  { %v3398_v59 = vpop.f32.mrb[2].mxu0 }
  0xed   :  { %v3400_v60 = vpop.f32.mrb[3].mxu0  ;;  %2475 = vmatmul.mubr.msk.f32.gmra.mrb[108].mxu0 %vm346_vm0, %v2944_v39  ;;  %v3404_v61 = vpop.f32.mrb[2].mxu1 }
  0xee   :  { %2501 = vmatmul.mubr.msk.f32.gmra.mrb[108].mxu1 %vm346_vm0, %v2944_v39  ;;  %v3408_v62 = vpop.f32.mrb[3].mxu1  ;;  %1463 = vmatprep.mubr.f32.mxu0 %v2632_v1 }
  0xef   :  { %1621 = vmatprep.mubr.f32.mxu1 %v2632_v1 }
  0xf0   :  { %v3412_v63 = vpop.f32.mrb[4].mxu0 }
  0xf1   :  { %v3414_v0 = vpop.f32.mrb[5].mxu0  ;;  %2476 = vmatmul.mubr.msk.f32.gmra.mrb[110].mxu0 %vm346_vm0, %v2955_v40  ;;  %v3418_v2 = vpop.f32.mrb[4].mxu1 }
  0xf2   :  { %2502 = vmatmul.mubr.msk.f32.gmra.mrb[110].mxu1 %vm346_vm0, %v2955_v40  ;;  %v3422_v3 = vpop.f32.mrb[5].mxu1  ;;  %1469 = vmatprep.mubr.f32.mxu0 %v2632_v1 }
  0xf3   :  { %1626 = vmatprep.mubr.f32.mxu1 %v2632_v1 }
  0xf4   :  { %v3426_v4 = vpop.f32.mrb[6].mxu0 }
  0xf5   :  { %v3428_v5 = vpop.f32.mrb[7].mxu0  ;;  %2477 = vmatmul.mubr.msk.f32.gmra.mrb[112].mxu0 %vm346_vm0, %v2966_v41  ;;  %v3432_v6 = vpop.f32.mrb[6].mxu1 }
  0xf6   :  { %2503 = vmatmul.mubr.msk.f32.gmra.mrb[112].mxu1 %vm346_vm0, %v2966_v41  ;;  %v3436_v7 = vpop.f32.mrb[7].mxu1  ;;  %1475 = vmatprep.mubr.f32.mxu0 %v2632_v1 }
  0xf7   :  { %1632 = vmatprep.mubr.f32.mxu1 %v2632_v1 }
  0xf8   :  { %v485_v8 = vpop.f32.mrb[8].mxu0 }
  0xf9   :  { %v487_v9 = vpop.f32.mrb[9].mxu0  ;;  %2478 = vmatmul.mubr.msk.f32.gmra.mrb[114].mxu0 %vm346_vm0, %v2977_v42  ;;  %v642_v10 = vpop.f32.mrb[8].mxu1 }
  0xfa   :  { %2504 = vmatmul.mubr.msk.f32.gmra.mrb[114].mxu1 %vm346_vm0, %v2977_v42  ;;  %v3444_v11 = vpop.f32.mrb[9].mxu1  ;;  %1481 = vmatprep.mubr.f32.mxu0 %v2632_v1 }
  0xfb   :  { %1638 = vmatprep.mubr.f32.mxu1 %v2632_v1 }
  0xfc   :  { %v491_v12 = vpop.f32.mrb[10].mxu0 }
  0xfd   :  { %v493_v13 = vpop.f32.mrb[11].mxu0  ;;  %2479 = vmatmul.mubr.msk.f32.gmra.mrb[116].mxu0 %vm346_vm0, %v2988_v43  ;;  %v648_v14 = vpop.f32.mrb[10].mxu1 }
  0xfe   :  { %2505 = vmatmul.mubr.msk.f32.gmra.mrb[116].mxu1 %vm346_vm0, %v2988_v43  ;;  %v3452_v15 = vpop.f32.mrb[11].mxu1  ;;  %1487 = vmatprep.mubr.f32.mxu0 %v2632_v1 }
  0xff   :  { %1644 = vmatprep.mubr.f32.mxu1 %v2632_v1 }
 0x100   :  { %v497_v16 = vpop.f32.mrb[12].mxu0 }
 0x101   :  { %v499_v17 = vpop.f32.mrb[13].mxu0  ;;  %2480 = vmatmul.mubr.msk.f32.gmra.mrb[118].mxu0 %vm346_vm0, %v2999_v44  ;;  %v654_v18 = vpop.f32.mrb[12].mxu1 }
 0x102   :  { %2506 = vmatmul.mubr.msk.f32.gmra.mrb[118].mxu1 %vm346_vm0, %v2999_v44  ;;  %v3460_v19 = vpop.f32.mrb[13].mxu1  ;;  %1493 = vmatprep.mubr.f32.mxu0 %v2632_v1 }
 0x103   :  { %1650 = vmatprep.mubr.f32.mxu1 %v2632_v1 }
 0x104   :  { %v503_v20 = vpop.f32.mrb[14].mxu0 }
 0x105   :  { %v505_v21 = vpop.f32.mrb[15].mxu0  ;;  %2481 = vmatmul.mubr.msk.f32.gmra.mrb[120].mxu0 %vm346_vm0, %v3010_v45  ;;  %v660_v22 = vpop.f32.mrb[14].mxu1 }
 0x106   :  { %2507 = vmatmul.mubr.msk.f32.gmra.mrb[120].mxu1 %vm346_vm0, %v3010_v45  ;;  %v3468_v23 = vpop.f32.mrb[15].mxu1  ;;  %1499 = vmatprep.mubr.f32.mxu0 %v2632_v1 }
 0x107   :  { %1656 = vmatprep.mubr.f32.mxu1 %v2632_v1 }
 0x108   :  { %v509_v24 = vpop.f32.mrb[16].mxu0 }
 0x109   :  { %v666_v25 = vpop.f32.mrb[16].mxu1  ;;  %v511_v26 = vpop.f32.mrb[17].mxu0  ;;  %2482 = vmatmul.mubr.msk.f32.gmra.mrb[122].mxu0 %vm346_vm0, %v3021_v46 }
 0x10a   :  { %v1677_v27 = vadd.f32 %v666_v25, %v487_v9  ;;  %v1676_v28 = vadd.f32 %v511_v26, %v485_v8  ;;  %v668_v29 = vpop.f32.mrb[17].mxu1  ;;  %2508 = vmatmul.mubr.msk.f32.gmra.mrb[122].mxu1 %vm346_vm0, %v3021_v46  ;;  %1505 = vmatprep.mubr.f32.mxu0 %v2632_v1 }
 0x10b   :  { %v3477_v30 = vadd.f32 %v668_v29, %v642_v10  ;;  %1662 = vmatprep.mubr.f32.mxu1 %v2632_v1 }
 0x10c   :  { %v515_v31 = vpop.f32.mrb[18].mxu0 }
 0x10d   :  { %v672_v32 = vpop.f32.mrb[18].mxu1  ;;  %v517_v33 = vpop.f32.mrb[19].mxu0  ;;  %2483 = vmatmul.mubr.msk.f32.gmra.mrb[124].mxu0 %vm346_vm0, %v3042_v49 }
 0x10e   :  { %v1693_v34 = vadd.f32 %v672_v32, %v493_v13  ;;  %v1692_v35 = vadd.f32 %v517_v33, %v491_v12  ;;  %v674_v36 = vpop.f32.mrb[19].mxu1  ;;  %2509 = vmatmul.mubr.msk.f32.gmra.mrb[124].mxu1 %vm346_vm0, %v3042_v49  ;;  %1511 = vmatprep.mubr.f32.mxu0 %v2632_v1 }
 0x10f   :  { %v3485_v37 = vadd.f32 %v674_v36, %v648_v14  ;;  %1668 = vmatprep.mubr.f32.mxu1 %v2632_v1 }
 0x110   :  { %v521_v38 = vpop.f32.mrb[20].mxu0 }
 0x111   :  { %v678_v39 = vpop.f32.mrb[20].mxu1  ;;  %v523_v40 = vpop.f32.mrb[21].mxu0  ;;  %2484 = vmatmul.mubr.msk.f32.gmra.mrb[126].mxu0 %vm346_vm0, %v3059_v52 }
 0x112   :  { %v3490_v41 = vadd.f32 %v678_v39, %v499_v17  ;;  %v1708_v42 = vadd.f32 %v523_v40, %v497_v16  ;;  %v680_v43 = vpop.f32.mrb[21].mxu1  ;;  %2510 = vmatmul.mubr.msk.f32.gmra.mrb[126].mxu1 %vm346_vm0, %v3059_v52 }
 0x113   :  { %v3494_v44 = vadd.f32 %v680_v43, %v654_v18 }
 0x114   :  { %v3496_v45 = vpop.f32.mrb[22].mxu0 }
 0x115   :  { %v684_v46 = vpop.f32.mrb[22].mxu1  ;;  %v529_v47 = vpop.f32.mrb[23].mxu0 }
 0x116   :  { %v3498_v1 = vadd.f32 %v684_v46, %v505_v21  ;;  %v1724_v48 = vadd.f32 %v529_v47, %v503_v20  ;;  %v686_v49 = vpop.f32.mrb[23].mxu1 }
 0x117   :  { %v3500_v50 = vadd.f32 %v686_v49, %v660_v22 }
 0x118   :  { %v533_v51 = vpop.f32.mrb[24].mxu0 }
 0x119   :  { %v690_v53 = vpop.f32.mrb[24].mxu1  ;;  %v534_v54 = vpop.f32.mrb[25].mxu0 }
 0x11a   :  { %v1740_v8 = vadd.f32 %v1676_v28, %v690_v53  ;;  %v1739_v9 = vadd.f32 %v534_v54, %v509_v24  ;;  %v692_v10 = vpop.f32.mrb[25].mxu1 }
 0x11b   :  { %v1741_v12 = vadd.f32 %v1677_v27, %v692_v10 }
 0x11c   :  { %vm1804_vm0 = vcmp.gt.f32.partialorder %v1740_v8, 0.0  ;;  %v1868_v52 = vmul.f32 0.01, %v1740_v8  ;;  %vm1803_vm6 = vcmp.gt.f32.partialorder %v1739_v9, 0.0  ;;  %v1867_v13 = vmul.f32 0.01, %v1739_v9 }
 0x11d   :  { %vm1805_vm7 = vcmp.gt.f32.partialorder %v1741_v12, 0.0  ;;  %v1869_v14 = vmul.f32 0.01, %v1741_v12  ;;  %v538_v16 = vpop.f32.mrb[26].mxu0  ;;  %v696_v17 = vpop.f32.mrb[26].mxu1 }
 0x11e   :  { %v1932_v18 = vsel %vm1804_vm0, %v1740_v8, %v1868_v52  ;;  %v1931_v20 = vsel %vm1803_vm6, %v1739_v9, %v1867_v13  ;;  %v1756_v21 = vadd.f32 %v1692_v35, %v696_v17  ;;  %v539_v22 = vpop.f32.mrb[27].mxu0  ;;  %v698_v25 = vpop.f32.mrb[27].mxu1 }
 0x11f   :  { %v1996_v26 = vadd.f32 %v1932_v18, %v3386_v56  ;;  %v1995_v28 = vadd.f32 %v1931_v20, %v3384_v55  ;;  %v1933_v24 = vsel %vm1805_vm7, %v1741_v12, %v1869_v14  ;;  %v1755_v29 = vadd.f32 %v539_v22, %v515_v31 }
 0x120   :  { %v1997_v27 = vadd.f32 %v1933_v24, %v3390_v57  ;;  %vm1820_vm8 = vcmp.gt.f32.partialorder %v1756_v21, 0.0  ;;  %v1884_v32 = vmul.f32 0.01, %v1756_v21  ;;  %v1757_v33 = vadd.f32 %v1693_v34, %v698_v25  ;;  %v543_v36 = vpop.f32.mrb[28].mxu0 }
 0x121   :  { %v2059_v39 = vmax.f32 %v1995_v28, %v1996_v26  ;;  %vm1819_vm9 = vcmp.gt.f32.partialorder %v1755_v29, 0.0  ;;  %v1883_v40 = vmul.f32 0.01, %v1755_v29  ;;  %v702_v43 = vpop.f32.mrb[28].mxu1  ;;  %v544_v46 = vpop.f32.mrb[29].mxu0 }
 0x122   :  { %v1948_v35 = vsel %vm1820_vm8, %v1756_v21, %v1884_v32  ;;  %vm1821_vm10 = vcmp.gt.f32.partialorder %v1757_v33, 0.0  ;;  %v1885_v47 = vmul.f32 0.01, %v1757_v33  ;;  %v1772_v49 = vadd.f32 %v1708_v42, %v702_v43  ;;  %v704_v56 = vpop.f32.mrb[29].mxu1 }
 0x123   :  { %v3505_v51 = vmax.f32 %v2059_v39, %v1997_v27  ;;  %v2012_v55 = vadd.f32 %v1948_v35, %v3400_v60  ;;  %v1947_v31 = vsel %vm1819_vm9, %v1755_v29, %v1883_v40  ;;  %v1771_v57 = vadd.f32 %v544_v46, %v521_v38 }
 0x124   :  { %v2011_v53 = vadd.f32 %v1947_v31, %v3398_v59  ;;  %v1949_v34 = vsel %vm1821_vm10, %v1757_v33, %v1885_v47  ;;  %vm1836_vm11 = vcmp.gt.f32.partialorder %v1772_v49, 0.0  ;;  %v1900_v54 = vmul.f32 0.01, %v1772_v49  ;;  %v548_v8 = vpop.f32.mrb[30].mxu0 }
 0x125   :  { %v2013_v9 = vadd.f32 %v1949_v34, %v3404_v61  ;;  %vm1835_vm12 = vcmp.gt.f32.partialorder %v1771_v57, 0.0  ;;  %v1899_v10 = vmul.f32 0.01, %v1771_v57  ;;  %v1773_v12 = vadd.f32 %v3490_v41, %v704_v56  ;;  %v708_v42 = vpop.f32.mrb[30].mxu1  ;;  %v549_v52 = vpop.f32.mrb[31].mxu0 }
 0x126   :  { %v2060_v13 = vmax.f32 %v2011_v53, %v2012_v55  ;;  %v1964_v14 = vsel %vm1836_vm11, %v1772_v49, %v1900_v54  ;;  %v1788_v16 = vadd.f32 %v1724_v48, %v708_v42  ;;  %v1787_v60 = vadd.f32 %v549_v52, %v3496_v45  ;;  %v710_v38 = vpop.f32.mrb[31].mxu1 }
 0x127   :  { %v2028_v59 = vadd.f32 %v1964_v14, %v3414_v0  ;;  %v1963_v17 = vsel %vm1835_vm12, %v1771_v57, %v1899_v10  ;;  %vm1837_vm13 = vcmp.gt.f32.partialorder %v1773_v12, 0.0  ;;  %v1901_v18 = vmul.f32 0.01, %v1773_v12 }
 0x128   :  { %v3513_v20 = vmax.f32 %v2060_v13, %v2013_v9  ;;  %v2027_v61 = vadd.f32 %v1963_v17, %v3412_v63  ;;  %vm1852_vm14 = vcmp.gt.f32.partialorder %v1788_v16, 0.0  ;;  %v1916_v21 = vmul.f32 0.01, %v1788_v16  ;;  %v3516_v41 = vpop.f32.mrb[32].mxu0 }
 0x129   :  { %v1965_v22 = vsel %vm1837_vm13, %v1773_v12, %v1901_v18  ;;  %vm1851_vm15 = vcmp.gt.f32.partialorder %v1787_v60, 0.0  ;;  %v1915_v25 = vmul.f32 0.01, %v1787_v60  ;;  %v1789_v48 = vadd.f32 %v3498_v1, %v710_v38  ;;  %v3519_v45 = vpop.f32.mrb[33].mxu0  ;;  %v3521_v26 = vpop.f32.mrb[32].mxu1 }
 0x12a   :  { %v2061_v0 = vmax.f32 %v2027_v61, %v2028_v59  ;;  %v2029_v28 = vadd.f32 %v1965_v22, %v3418_v2  ;;  %v1980_v24 = vsel %vm1852_vm14, %v1788_v16, %v1916_v21  ;;  %v3524_v29 = vpop.f32.mrb[33].mxu1 }
 0x12b   :  { %v2044_v63 = vadd.f32 %v1980_v24, %v3428_v5  ;;  %v1979_v27 = vsel %vm1851_vm15, %v1787_v60, %v1915_v25  ;;  %vm1853_vm1 = vcmp.gt.f32.partialorder %v1789_v48, 0.0  ;;  %v1917_v32 = vmul.f32 0.01, %v1789_v48 }
 0x12c   :  { %v3527_v33 = vmax.f32 %v2061_v0, %v2029_v28  ;;  %v2043_v36 = vadd.f32 %v1979_v27, %v3426_v4  ;;  %v3530_v1 = vpop.f32.mrb[34].mxu0 }
 0x12d   :  { %v1981_v39 = vsel %vm1853_vm1, %v1789_v48, %v1917_v32  ;;  %v3532_v40 = vpop.f32.mrb[35].mxu0  ;;  %v3534_v43 = vpop.f32.mrb[34].mxu1 }
 0x12e   :  { %v2062_v2 = vmax.f32 %v2043_v36, %v2044_v63  ;;  %v2045_v46 = vadd.f32 %v1981_v39, %v3432_v6  ;;  %v3537_v35 = vpop.f32.mrb[35].mxu1 }
 0x130   :  { %v3539_v5 = vmax.f32 %v2062_v2, %v2045_v46  ;;  %v3541_v47 = vpop.f32.mrb[36].mxu0 }
 0x131   :  { %v3543_v49 = vpop.f32.mrb[37].mxu0  ;;  %v3545_v56 = vpop.f32.mrb[36].mxu1 }
 0x132   :  { %v3547_v4 = vpop.f32.mrb[37].mxu1 }
 0x133   :  { %3871 = vst [vmem:[#allocation5_spill] sm:$0xff] %v3547_v4 }
 0x134   :  { %v3549_v55 = vpop.f32.mrb[38].mxu0 }
 0x135   :  { %v3551_v31 = vpop.f32.mrb[39].mxu0  ;;  %v3553_v57 = vpop.f32.mrb[38].mxu1 }
 0x136   :  { %v3555_v53 = vpop.f32.mrb[39].mxu1 }
 0x137   :  { %3872 = vst [vmem:[#allocation6_spill] sm:$0xff] %v3555_v53 }
 0x138   :  { %v803_v6 = vpop.f32.mrb[40].mxu0 }
 0x139   :  { %v805_v34 = vpop.f32.mrb[41].mxu0  ;;  %v964_v54 = vpop.f32.mrb[40].mxu1 }
 0x13a   :  { %v3557_v8 = vpop.f32.mrb[41].mxu1 }
 0x13c   :  { %v809_v9 = vpop.f32.mrb[42].mxu0 }
 0x13d   :  { %v811_v10 = vpop.f32.mrb[43].mxu0  ;;  %v970_v12 = vpop.f32.mrb[42].mxu1 }
 0x13e   :  { %v3559_v42 = vpop.f32.mrb[43].mxu1 }
 0x140   :  { %v815_v52 = vpop.f32.mrb[44].mxu0 }
 0x141   :  { %v817_v13 = vpop.f32.mrb[45].mxu0  ;;  %v976_v14 = vpop.f32.mrb[44].mxu1 }
 0x142   :  { %v3561_v16 = vpop.f32.mrb[45].mxu1 }
 0x144   :  { %v821_v60 = vpop.f32.mrb[46].mxu0 }
 0x145   :  { %v823_v38 = vpop.f32.mrb[47].mxu0  ;;  %v982_v59 = vpop.f32.mrb[46].mxu1 }
 0x146   :  { %v3563_v17 = vpop.f32.mrb[47].mxu1 }
 0x148   :  { %v827_v18 = vpop.f32.mrb[48].mxu0 }
 0x149   :  { %v1679_v61 = vadd.f32 %v827_v18, %v3444_v11  ;;  %v988_v21 = vpop.f32.mrb[48].mxu1  ;;  %v829_v22 = vpop.f32.mrb[49].mxu0 }
 0x14a   :  { %v1681_v25 = vadd.f32 %v988_v21, %v805_v34  ;;  %v1680_v48 = vadd.f32 %v829_v22, %v803_v6  ;;  %v990_v0 = vpop.f32.mrb[49].mxu1 }
 0x14b   :  { %v3566_v28 = vadd.f32 %v990_v0, %v964_v54 }
 0x14c   :  { %v833_v24 = vpop.f32.mrb[50].mxu0 }
 0x14d   :  { %v1695_v63 = vadd.f32 %v833_v24, %v3452_v15  ;;  %v994_v27 = vpop.f32.mrb[50].mxu1  ;;  %v835_v32 = vpop.f32.mrb[51].mxu0 }
 0x14e   :  { %v1697_v36 = vadd.f32 %v994_v27, %v811_v10  ;;  %v1696_v39 = vadd.f32 %v835_v32, %v809_v9  ;;  %v996_v2 = vpop.f32.mrb[51].mxu1 }
 0x14f   :  { %v3569_v46 = vadd.f32 %v996_v2, %v970_v12 }
 0x150   :  { %v839_v53 = vpop.f32.mrb[52].mxu0 }
 0x151   :  { %v3572_v11 = vadd.f32 %v839_v53, %v3460_v19  ;;  %v1000_v18 = vpop.f32.mrb[52].mxu1  ;;  %v841_v34 = vpop.f32.mrb[53].mxu0 }
 0x152   :  { %v3574_v6 = vadd.f32 %v1000_v18, %v817_v13  ;;  %v1712_v54 = vadd.f32 %v841_v34, %v815_v52  ;;  %v1002_v21 = vpop.f32.mrb[53].mxu1 }
 0x153   :  { %v3576_v22 = vadd.f32 %v1002_v21, %v976_v14 }
 0x154   :  { %v845_v15 = vpop.f32.mrb[54].mxu0 }
 0x155   :  { %v3579_v0 = vadd.f32 %v845_v15, %v3468_v23  ;;  %v1006_v9 = vpop.f32.mrb[54].mxu1  ;;  %v847_v10 = vpop.f32.mrb[55].mxu0 }
 0x156   :  { %v3581_v12 = vadd.f32 %v1006_v9, %v823_v38  ;;  %v3583_v24 = vadd.f32 %v847_v10, %v821_v60  ;;  %v1008_v19 = vpop.f32.mrb[55].mxu1 }
 0x157   :  { %v3585_v53 = vadd.f32 %v1008_v19, %v982_v59 }
 0x158   :  { %v851_v27 = vpop.f32.mrb[56].mxu0 }
 0x159   :  { %3873 = vst [vmem:[#allocation7_spill] sm:$0xff] %v3585_v53  ;;  %v1742_v13 = vadd.f32 %v3477_v30, %v851_v27  ;;  %v1012_v52 = vpop.f32.mrb[56].mxu1  ;;  %v853_v32 = vpop.f32.mrb[57].mxu0 }
 0x15a   :  { %v1744_v14 = vadd.f32 %v1680_v48, %v1012_v52  ;;  %v1743_v2 = vadd.f32 %v1679_v61, %v853_v32  ;;  %v1014_v18 = vpop.f32.mrb[57].mxu1 }
 0x15b   :  { %vm1806_vm2 = vcmp.gt.f32.partialorder %v1742_v13, 0.0  ;;  %v1870_v23 = vmul.f32 0.01, %v1742_v13  ;;  %v1745_v34 = vadd.f32 %v1681_v25, %v1014_v18 }
 0x15c   :  { %vm1808_vm3 = vcmp.gt.f32.partialorder %v1744_v14, 0.0  ;;  %v1872_v21 = vmul.f32 0.01, %v1744_v14  ;;  %vm1807_vm4 = vcmp.gt.f32.partialorder %v1743_v2, 0.0  ;;  %v1871_v38 = vmul.f32 0.01, %v1743_v2 }
 0x15d   :  { %v1934_v60 = vsel %vm1806_vm2, %v1742_v13, %v1870_v23  ;;  %vm1809_vm5 = vcmp.gt.f32.partialorder %v1745_v34, 0.0  ;;  %v1873_v15 = vmul.f32 0.01, %v1745_v34  ;;  %v857_v59 = vpop.f32.mrb[58].mxu0  ;;  %v1018_v9 = vpop.f32.mrb[58].mxu1  ;;  %vm2123_vm2 = vcmask 261120  }
 0x15e   :  { %v1998_v10 = vadd.f32 %v1934_v60, %v3394_v58  ;;  %v1936_v30 = vsel %vm1808_vm3, %v1744_v14, %v1872_v21  ;;  %v1935_v19 = vsel %vm1807_vm4, %v1743_v2, %v1871_v38  ;;  %v1758_v48 = vadd.f32 %v3485_v37, %v857_v59  ;;  %v859_v61 = vpop.f32.mrb[59].mxu0  ;;  %v1020_v27 = vpop.f32.mrb[59].mxu1 }
 0x15f   :  { %v2000_v52 = vadd.f32 %v1936_v30, %v3519_v45  ;;  %v1999_v25 = vadd.f32 %v1935_v19, %v3516_v41  ;;  %v1937_v32 = vsel %vm1809_vm5, %v1745_v34, %v1873_v15  ;;  %v1760_v18 = vadd.f32 %v1696_v39, %v1018_v9 }
 0x160   :  { %v2067_v13 = vmax.f32 %v3505_v51, %v1998_v10  ;;  %v2001_v23 = vadd.f32 %v1937_v32, %v3521_v26  ;;  %vm1822_vm0 = vcmp.gt.f32.partialorder %v1758_v48, 0.0  ;;  %v1886_v53 = vmul.f32 0.01, %v1758_v48  ;;  %v863_v4 = vpop.f32.mrb[60].mxu0 }
 0x161   :  { %vm1824_vm6 = vcmp.gt.f32.partialorder %v1760_v18, 0.0  ;;  %v1888_v58 = vmul.f32 0.01, %v1760_v18  ;;  %v1759_v14 = vadd.f32 %v1695_v63, %v859_v61  ;;  %v1761_v2 = vadd.f32 %v1697_v36, %v1020_v27  ;;  %v1024_v37 = vpop.f32.mrb[60].mxu1  ;;  %v865_v21 = vpop.f32.mrb[61].mxu0 }
 0x162   :  { %v2071_v38 = vmax.f32 %v2067_v13, %v1999_v25  ;;  %v1950_v60 = vsel %vm1822_vm0, %v1758_v48, %v1886_v53  ;;  %v1774_v45 = vadd.f32 %v3494_v44, %v863_v4  ;;  %v1776_v41 = vadd.f32 %v1712_v54, %v1024_v37  ;;  %v1026_v34 = vpop.f32.mrb[61].mxu1 }
 0x163   :  { %v2014_v39 = vadd.f32 %v1950_v60, %v3408_v62  ;;  %v1952_v51 = vsel %vm1824_vm6, %v1760_v18, %v1888_v58  ;;  %vm1823_vm7 = vcmp.gt.f32.partialorder %v1759_v14, 0.0  ;;  %v1887_v26 = vmul.f32 0.01, %v1759_v14 }
 0x164   :  { %v2075_v15 = vmax.f32 %v2071_v38, %v2000_v52  ;;  %v2016_v59 = vadd.f32 %v1952_v51, %v3532_v40  ;;  %vm1825_vm8 = vcmp.gt.f32.partialorder %v1761_v2, 0.0  ;;  %v1889_v9 = vmul.f32 0.01, %v1761_v2  ;;  %v869_v63 = vpop.f32.mrb[62].mxu0 }
 0x165   :  { %v2068_v36 = vmax.f32 %v3513_v20, %v2014_v39  ;;  %v1951_v10 = vsel %vm1823_vm7, %v1759_v14, %v1887_v26  ;;  %vm1838_vm9 = vcmp.gt.f32.partialorder %v1774_v45, 0.0  ;;  %v1902_v53 = vmul.f32 0.01, %v1774_v45  ;;  %v1030_v30 = vpop.f32.mrb[62].mxu1  ;;  %v871_v44 = vpop.f32.mrb[63].mxu0 }
 0x166   :  { %v3598_v4 = vmax.f32 %v2075_v15, %v2001_v23  ;;  %v2015_v62 = vadd.f32 %v1951_v10, %v3530_v1  ;;  %v1953_v54 = vsel %vm1825_vm8, %v1761_v2, %v1889_v9  ;;  %vm1840_vm10 = vcmp.gt.f32.partialorder %v1776_v41, 0.0  ;;  %v1032_v19 = vpop.f32.mrb[63].mxu1 }
 0x167   :  { %v2017_v48 = vadd.f32 %v1953_v54, %v3534_v43  ;;  %v1966_v40 = vsel %vm1838_vm9, %v1774_v45, %v1902_v53  ;;  %v1904_v61 = vmul.f32 0.01, %v1776_v41  ;;  %v1775_v27 = vadd.f32 %v3572_v11, %v865_v21 }
 0x168   :  { %v2072_v52 = vmax.f32 %v2068_v36, %v2015_v62  ;;  %v2030_v20 = vadd.f32 %v1966_v40, %v3422_v3  ;;  %v1777_v25 = vadd.f32 %v3574_v6, %v1026_v34  ;;  %v1790_v32 = vadd.f32 %v3500_v50, %v869_v63  ;;  %v3606_v18 = vpop.f32.mrb[64].mxu0 }
 0x169   :  { %v1968_v13 = vsel %vm1840_vm10, %v1776_v41, %v1904_v61  ;;  %vm1839_vm11 = vcmp.gt.f32.partialorder %v1775_v27, 0.0  ;;  %v1903_v1 = vmul.f32 0.01, %v1775_v27  ;;  %v1792_v23 = vadd.f32 %v3583_v24, %v1030_v30  ;;  %v3609_v58 = vpop.f32.mrb[65].mxu0  ;;  %v3611_v43 = vpop.f32.mrb[64].mxu1 }
 0x16a   :  { %v2076_v14 = vmax.f32 %v2072_v52, %v2016_v59  ;;  %v2069_v11 = vmax.f32 %v3527_v33, %v2030_v20  ;;  %v2032_v3 = vadd.f32 %v1968_v13, %v3543_v49  ;;  %vm1841_vm12 = vcmp.gt.f32.partialorder %v1777_v25, 0.0  ;;  %v3615_v6 = vpop.f32.mrb[65].mxu1 }
 0x16b   :  { %v1967_v50 = vsel %vm1839_vm11, %v1775_v27, %v1903_v1  ;;  %v1905_v2 = vmul.f32 0.01, %v1777_v25  ;;  %vm1854_vm13 = vcmp.gt.f32.partialorder %v1790_v32, 0.0  ;;  %v1918_v37 = vmul.f32 0.01, %v1790_v32 }
 0x16c   :  { %v3617_v21 = vmax.f32 %v2076_v14, %v2017_v48  ;;  %v2031_v24 = vadd.f32 %v1967_v50, %v3541_v47  ;;  %vm1856_vm14 = vcmp.gt.f32.partialorder %v1792_v23, 0.0  ;;  %v1920_v38 = vmul.f32 0.01, %v1792_v23  ;;  %v3620_v60 = vpop.f32.mrb[66].mxu0  ;;  %v2119_v14 = vld [vmem:[%s3860_s2] sm:$0xff] }
 0x16d   :  { %v1969_v45 = vsel %vm1841_vm12, %v1777_v25, %v1905_v2  ;;  %v1982_v41 = vsel %vm1854_vm13, %v1790_v32, %v1918_v37  ;;  %v1791_v33 = vadd.f32 %v3579_v0, %v871_v44  ;;  %v1793_v49 = vadd.f32 %v3581_v12, %v1032_v19  ;;  %v3624_v34 = vpop.f32.mrb[67].mxu0  ;;  %v3626_v39 = vpop.f32.mrb[66].mxu1  ;;  %2527 = vmatprep.mubr.msk.f32.mxu0 %vm2123_vm2, %v2119_v14 }
 0x16e   :  { %v2073_v51 = vmax.f32 %v2069_v11, %v2031_v24  ;;  %v2033_v26 = vadd.f32 %v1969_v45, %v3545_v56  ;;  %v2046_v15 = vadd.f32 %v1982_v41, %v3436_v7  ;;  %v1984_v47 = vsel %vm1856_vm14, %v1792_v23, %v1920_v38  ;;  %v3630_v59 = vpop.f32.mrb[67].mxu1 }
 0x16f   :  { %v2048_v9 = vadd.f32 %v1984_v47, %v3551_v31  ;;  %vm1855_vm15 = vcmp.gt.f32.partialorder %v1791_v33, 0.0  ;;  %v1919_v63 = vmul.f32 0.01, %v1791_v33  ;;  %vm1857_vm1 = vcmp.gt.f32.partialorder %v1793_v49, 0.0 }
 0x170   :  { %v2077_v0 = vmax.f32 %v2073_v51, %v2032_v3  ;;  %v2070_v12 = vmax.f32 %v3539_v5, %v2046_v15  ;;  %v1921_v36 = vmul.f32 0.01, %v1793_v49  ;;  %v3634_v10 = vpop.f32.mrb[68].mxu0 }
 0x171   :  { %v1983_v53 = vsel %vm1855_vm15, %v1791_v33, %v1919_v63  ;;  %v3636_v30 = vpop.f32.mrb[69].mxu0  ;;  %v3638_v56 = vpop.f32.mrb[68].mxu1 }
 0x172   :  { %v3640_v7 = vmax.f32 %v2077_v0, %v2033_v26  ;;  %v2047_v44 = vadd.f32 %v1983_v53, %v3549_v55  ;;  %v1985_v62 = vsel %vm1857_vm1, %v1793_v49, %v1921_v36  ;;  %v3643_v31 = vpop.f32.mrb[69].mxu1 }
 0x173   :  { %v2049_v54 = vadd.f32 %v1985_v62, %v3553_v57 }
 0x174   :  { %v2074_v19 = vmax.f32 %v2070_v12, %v2047_v44  ;;  %v3646_v48 = vpop.f32.mrb[70].mxu0 }
 0x175   :  { %v3648_v5 = vpop.f32.mrb[71].mxu0  ;;  %v3650_v40 = vpop.f32.mrb[70].mxu1 }
 0x176   :  { %v2078_v61 = vmax.f32 %v2074_v19, %v2048_v9  ;;  %v3652_v27 = vpop.f32.mrb[71].mxu1 }
 0x178   :  { %v3654_v52 = vmax.f32 %v2078_v61, %v2049_v54  ;;  %v1125_v20 = vpop.f32.mrb[72].mxu0 }
 0x179   :  { %v1127_v25 = vpop.f32.mrb[73].mxu0  ;;  %v1286_v55 = vpop.f32.mrb[72].mxu1 }
 0x17a   :  { %v3656_v32 = vpop.f32.mrb[73].mxu1 }
 0x17c   :  { %v1131_v13 = vpop.f32.mrb[74].mxu0 }
 0x17d   :  { %v1133_v1 = vpop.f32.mrb[75].mxu0  ;;  %v1292_v57 = vpop.f32.mrb[74].mxu1 }
 0x17e   :  { %v3658_v23 = vpop.f32.mrb[75].mxu1 }
 0x180   :  { %v1137_v11 = vpop.f32.mrb[76].mxu0 }
 0x181   :  { %v1139_v3 = vpop.f32.mrb[77].mxu0  ;;  %v1298_v50 = vpop.f32.mrb[76].mxu1 }
 0x182   :  { %v3664_v2 = vpop.f32.mrb[77].mxu1 }
 0x184   :  { %v1143_v37 = vpop.f32.mrb[78].mxu0 }
 0x185   :  { %v1145_v24 = vpop.f32.mrb[79].mxu0  ;;  %v1304_v38 = vpop.f32.mrb[78].mxu1 }
 0x186   :  { %v3666_v45 = vpop.f32.mrb[79].mxu1 }
 0x188   :  { %v1149_v41 = vpop.f32.mrb[80].mxu0 }
 0x189   :  { %v1683_v33 = vadd.f32 %v1149_v41, %v3557_v8  ;;  %v1310_v49 = vpop.f32.mrb[80].mxu1  ;;  %v1151_v51 = vpop.f32.mrb[81].mxu0 }
 0x18a   :  { %v1685_v26 = vadd.f32 %v1310_v49, %v1127_v25  ;;  %v1684_v15 = vadd.f32 %v1151_v51, %v1125_v20  ;;  %v1312_v47 = vpop.f32.mrb[81].mxu1 }
 0x18b   :  { %v3669_v9 = vadd.f32 %v1312_v47, %v1286_v55 }
 0x18c   :  { %v1155_v63 = vpop.f32.mrb[82].mxu0 }
 0x18d   :  { %v1699_v0 = vadd.f32 %v1155_v63, %v3559_v42  ;;  %v1316_v12 = vpop.f32.mrb[82].mxu1  ;;  %v1157_v36 = vpop.f32.mrb[83].mxu0 }
 0x18e   :  { %v1701_v53 = vadd.f32 %v1316_v12, %v1133_v1  ;;  %v1700_v44 = vadd.f32 %v1157_v36, %v1131_v13  ;;  %v1318_v62 = vpop.f32.mrb[83].mxu1 }
 0x18f   :  { %v3672_v54 = vadd.f32 %v1318_v62, %v1292_v57 }
 0x190   :  { %v1161_v19 = vpop.f32.mrb[84].mxu0 }
 0x191   :  { %v3675_v8 = vadd.f32 %v1161_v19, %v3561_v16  ;;  %v1322_v61 = vpop.f32.mrb[84].mxu1  ;;  %v1163_v25 = vpop.f32.mrb[85].mxu0 }
 0x192   :  { %v3677_v20 = vadd.f32 %v1322_v61, %v1139_v3  ;;  %v1716_v55 = vadd.f32 %v1163_v25, %v1137_v11  ;;  %v1324_v14 = vpop.f32.mrb[85].mxu1 }
 0x193   :  { %v3679_v41 = vadd.f32 %v1324_v14, %v1298_v50 }
 0x194   :  { %v1167_v42 = vpop.f32.mrb[86].mxu0 }
 0x195   :  { %v3682_v49 = vadd.f32 %v1167_v42, %v3563_v17  ;;  %v1328_v13 = vpop.f32.mrb[86].mxu1  ;;  %v1169_v1 = vpop.f32.mrb[87].mxu0 }
 0x196   :  { %v3684_v57 = vadd.f32 %v1328_v13, %v1145_v24  ;;  %v3686_v51 = vadd.f32 %v1169_v1, %v1143_v37  ;;  %v1330_v16 = vpop.f32.mrb[87].mxu1 }
 0x197   :  { %v3688_v47 = vadd.f32 %v1330_v16, %v1304_v38 }
 0x198   :  { %v1173_v63 = vpop.f32.mrb[88].mxu0 }
 0x199   :  { %v1746_v3 = vadd.f32 %v3566_v28, %v1173_v63  ;;  %v1334_v11 = vpop.f32.mrb[88].mxu1  ;;  %v1175_v12 = vpop.f32.mrb[89].mxu0 }
 0x19a   :  { %v1748_v50 = vadd.f32 %v1684_v15, %v1334_v11  ;;  %v1747_v36 = vadd.f32 %v1683_v33, %v1175_v12  ;;  %v1336_v62 = vpop.f32.mrb[89].mxu1 }
 0x19b   :  { %vm1810_vm3 = vcmp.gt.f32.partialorder %v1746_v3, 0.0  ;;  %v1874_v17 = vmul.f32 0.01, %v1746_v3  ;;  %v1749_v19 = vadd.f32 %v1685_v26, %v1336_v62 }
 0x19c   :  { %vm1812_vm4 = vcmp.gt.f32.partialorder %v1748_v50, 0.0  ;;  %v1876_v61 = vmul.f32 0.01, %v1748_v50  ;;  %vm1811_vm5 = vcmp.gt.f32.partialorder %v1747_v36, 0.0  ;;  %v1875_v24 = vmul.f32 0.01, %v1747_v36 }
 0x19d   :  { %v1938_v37 = vsel %vm1810_vm3, %v1746_v3, %v1874_v17  ;;  %vm1813_vm0 = vcmp.gt.f32.partialorder %v1749_v19, 0.0  ;;  %v1877_v25 = vmul.f32 0.01, %v1749_v19  ;;  %v1179_v38 = vpop.f32.mrb[90].mxu0  ;;  %v1340_v14 = vpop.f32.mrb[90].mxu1 }
 0x19e   :  { %v2002_v42 = vadd.f32 %v1938_v37, %v3524_v29  ;;  %v1940_v28 = vsel %vm1812_vm4, %v1748_v50, %v1876_v61  ;;  %v1939_v13 = vsel %vm1811_vm5, %v1747_v36, %v1875_v24  ;;  %v1762_v15 = vadd.f32 %v3569_v46, %v1179_v38  ;;  %v1181_v33 = vpop.f32.mrb[91].mxu0  ;;  %v1342_v1 = vpop.f32.mrb[91].mxu1 }
 0x19f   :  { %v2004_v16 = vadd.f32 %v1940_v28, %v3609_v58  ;;  %v2003_v26 = vadd.f32 %v1939_v13, %v3606_v18  ;;  %v1941_v63 = vsel %vm1813_vm0, %v1749_v19, %v1877_v25  ;;  %v1764_v11 = vadd.f32 %v1700_v44, %v1340_v14 }
 0x1a0   :  { %v2083_v3 = vmax.f32 %v3598_v4, %v2002_v42  ;;  %v2005_v12 = vadd.f32 %v1941_v63, %v3611_v43  ;;  %vm1826_vm6 = vcmp.gt.f32.partialorder %v1762_v15, 0.0  ;;  %v1890_v62 = vmul.f32 0.01, %v1762_v15  ;;  %v1185_v17 = vpop.f32.mrb[92].mxu0 }
 0x1a1   :  { %vm1828_vm7 = vcmp.gt.f32.partialorder %v1764_v11, 0.0  ;;  %v1892_v29 = vmul.f32 0.01, %v1764_v11  ;;  %v1763_v50 = vadd.f32 %v1699_v0, %v1181_v33  ;;  %v1765_v36 = vadd.f32 %v1701_v53, %v1342_v1  ;;  %v1346_v46 = vpop.f32.mrb[92].mxu1  ;;  %v1187_v61 = vpop.f32.mrb[93].mxu0 }
 0x1a2   :  { %v2087_v24 = vmax.f32 %v2083_v3, %v2003_v26  ;;  %v1954_v37 = vsel %vm1826_vm6, %v1762_v15, %v1890_v62  ;;  %v1778_v58 = vadd.f32 %v3576_v22, %v1185_v17  ;;  %v1780_v18 = vadd.f32 %v1716_v55, %v1346_v46  ;;  %v1348_v19 = vpop.f32.mrb[93].mxu1  ;;  %v3875_v62 = vld [vmem:[#allocation7_spill] sm:$0xff] }
 0x1a3   :  { %v2018_v44 = vadd.f32 %v1954_v37, %v3537_v35  ;;  %v1956_v4 = vsel %vm1828_vm7, %v1764_v11, %v1892_v29  ;;  %vm1827_vm8 = vcmp.gt.f32.partialorder %v1763_v50, 0.0  ;;  %v1891_v43 = vmul.f32 0.01, %v1763_v50 }
 0x1a4   :  { %v2091_v25 = vmax.f32 %v2087_v24, %v2004_v16  ;;  %v2020_v38 = vadd.f32 %v1956_v4, %v3624_v34  ;;  %vm1829_vm9 = vcmp.gt.f32.partialorder %v1765_v36, 0.0  ;;  %v1893_v14 = vmul.f32 0.01, %v1765_v36  ;;  %v1191_v0 = vpop.f32.mrb[94].mxu0 }
 0x1a5   :  { %v2084_v53 = vmax.f32 %v3617_v21, %v2018_v44  ;;  %v1955_v42 = vsel %vm1827_vm8, %v1763_v50, %v1891_v43  ;;  %vm1842_vm10 = vcmp.gt.f32.partialorder %v1778_v58, 0.0  ;;  %v1906_v28 = vmul.f32 0.01, %v1778_v58  ;;  %v1352_v13 = vpop.f32.mrb[94].mxu1  ;;  %v1193_v22 = vpop.f32.mrb[95].mxu0  ;;  %v3874_v21 = vld [vmem:[#allocation5_spill] sm:$0xff] }
 0x1a6   :  { %v3701_v55 = vmax.f32 %v2091_v25, %v2005_v12  ;;  %v2019_v35 = vadd.f32 %v1955_v42, %v3620_v60  ;;  %v1957_v15 = vsel %vm1829_vm9, %v1765_v36, %v1893_v14  ;;  %vm1844_vm11 = vcmp.gt.f32.partialorder %v1780_v18, 0.0  ;;  %v1354_v33 = vpop.f32.mrb[95].mxu1 }
 0x1a7   :  { %v2021_v1 = vadd.f32 %v1957_v15, %v3626_v39  ;;  %v1970_v34 = vsel %vm1842_vm10, %v1778_v58, %v1906_v28  ;;  %v1908_v16 = vmul.f32 0.01, %v1780_v18  ;;  %v1779_v26 = vadd.f32 %v3675_v8, %v1187_v61 }
 0x1a8   :  { %v2088_v63 = vmax.f32 %v2084_v53, %v2019_v35  ;;  %v2034_v11 = vadd.f32 %v1970_v34, %v3874_v21  ;;  %v1781_v3 = vadd.f32 %v3677_v20, %v1348_v19  ;;  %v1794_v17 = vadd.f32 %v3875_v62, %v1191_v0  ;;  %v3709_v12 = vpop.f32.mrb[96].mxu0  ;;  %v3876_v53 = vld [vmem:[#allocation6_spill] sm:$0xff] }
 0x1a9   :  { %v1972_v29 = vsel %vm1844_vm11, %v1780_v18, %v1908_v16  ;;  %vm1843_vm12 = vcmp.gt.f32.partialorder %v1779_v26, 0.0  ;;  %v1907_v60 = vmul.f32 0.01, %v1779_v26  ;;  %v1796_v50 = vadd.f32 %v3686_v51, %v1352_v13  ;;  %v3712_v36 = vpop.f32.mrb[97].mxu0  ;;  %v3714_v39 = vpop.f32.mrb[96].mxu1 }
 0x1aa   :  { %v2092_v46 = vmax.f32 %v2088_v63, %v2020_v38  ;;  %v2085_v8 = vmax.f32 %v3640_v7, %v2034_v11  ;;  %v2036_v61 = vadd.f32 %v1972_v29, %v3636_v30  ;;  %vm1845_vm13 = vcmp.gt.f32.partialorder %v1781_v3, 0.0  ;;  %v3718_v20 = vpop.f32.mrb[97].mxu1 }
 0x1ab   :  { %v1971_v24 = vsel %vm1843_vm12, %v1779_v26, %v1907_v60  ;;  %v1909_v37 = vmul.f32 0.01, %v1781_v3  ;;  %vm1858_vm14 = vcmp.gt.f32.partialorder %v1794_v17, 0.0  ;;  %v1922_v58 = vmul.f32 0.01, %v1794_v17 }
 0x1ac   :  { %v3720_v18 = vmax.f32 %v2092_v46, %v2021_v1  ;;  %v2035_v51 = vadd.f32 %v1971_v24, %v3634_v10  ;;  %vm1860_vm15 = vcmp.gt.f32.partialorder %v1796_v50, 0.0  ;;  %v1924_v19 = vmul.f32 0.01, %v1796_v50  ;;  %v3723_v44 = vpop.f32.mrb[98].mxu0 }
 0x1ad   :  { %v1973_v4 = vsel %vm1845_vm13, %v1781_v3, %v1909_v37  ;;  %v1986_v43 = vsel %vm1858_vm14, %v1794_v17, %v1922_v58  ;;  %v1795_v7 = vadd.f32 %v3682_v49, %v1193_v22  ;;  %v1797_v30 = vadd.f32 %v3684_v57, %v1354_v33  ;;  %v3727_v25 = vpop.f32.mrb[99].mxu0  ;;  %v3729_v38 = vpop.f32.mrb[98].mxu1 }
 0x1ae   :  { %v2089_v14 = vmax.f32 %v2085_v8, %v2035_v51  ;;  %v2037_v0 = vadd.f32 %v1973_v4, %v3638_v56  ;;  %v2050_v42 = vadd.f32 %v1986_v43, %v3876_v53  ;;  %v1988_v10 = vsel %vm1860_vm15, %v1796_v50, %v1924_v19  ;;  %v3733_v28 = vpop.f32.mrb[99].mxu1 }
 0x1af   :  { %v2052_v13 = vadd.f32 %v1988_v10, %v3648_v5  ;;  %vm1859_vm1 = vcmp.gt.f32.partialorder %v1795_v7, 0.0  ;;  %v1923_v35 = vmul.f32 0.01, %v1795_v7  ;;  %vm1861_vm3 = vcmp.gt.f32.partialorder %v1797_v30, 0.0 }
 0x1b0   :  { %v2093_v49 = vmax.f32 %v2089_v14, %v2036_v61  ;;  %v2086_v57 = vmax.f32 %v3654_v52, %v2050_v42  ;;  %v1925_v22 = vmul.f32 0.01, %v1797_v30  ;;  %v3737_v15 = vpop.f32.mrb[100].mxu0 }
 0x1b1   :  { %v1987_v33 = vsel %vm1859_vm1, %v1795_v7, %v1923_v35  ;;  %v3739_v1 = vpop.f32.mrb[101].mxu0  ;;  %v3741_v56 = vpop.f32.mrb[100].mxu1 }
 0x1b2   :  { %v3743_v34 = vmax.f32 %v2093_v49, %v2037_v0  ;;  %v2051_v16 = vadd.f32 %v1987_v33, %v3646_v48  ;;  %v1989_v26 = vsel %vm1861_vm3, %v1797_v30, %v1925_v22  ;;  %v3746_v5 = vpop.f32.mrb[101].mxu1 }
 0x1b3   :  { %v2053_v63 = vadd.f32 %v1989_v26, %v3650_v40 }
 0x1b4   :  { %v2090_v21 = vmax.f32 %v2086_v57, %v2051_v16  ;;  %v3749_v11 = vpop.f32.mrb[102].mxu0 }
 0x1b5   :  { %v3751_v52 = vpop.f32.mrb[103].mxu0  ;;  %v3753_v3 = vpop.f32.mrb[102].mxu1 }
 0x1b6   :  { %v2094_v62 = vmax.f32 %v2090_v21, %v2052_v13  ;;  %v3755_v17 = vpop.f32.mrb[103].mxu1 }
 0x1b8   :  { %v3757_v29 = vmax.f32 %v2094_v62, %v2053_v63  ;;  %v1447_v60 = vpop.f32.mrb[104].mxu0 }
 0x1b9   :  { %v1449_v50 = vpop.f32.mrb[105].mxu0  ;;  %v1608_v48 = vpop.f32.mrb[104].mxu1 }
 0x1ba   :  { %v1610_v46 = vpop.f32.mrb[105].mxu1 }
 0x1bc   :  { %v1453_v8 = vpop.f32.mrb[106].mxu0 }
 0x1bd   :  { %v1455_v61 = vpop.f32.mrb[107].mxu0  ;;  %v1613_v24 = vpop.f32.mrb[106].mxu1 }
 0x1be   :  { %v1615_v40 = vpop.f32.mrb[107].mxu1 }
 0x1c0   :  { %v1459_v37 = vpop.f32.mrb[108].mxu0 }
 0x1c1   :  { %v1461_v58 = vpop.f32.mrb[109].mxu0  ;;  %v1618_v51 = vpop.f32.mrb[108].mxu1 }
 0x1c2   :  { %v1620_v19 = vpop.f32.mrb[109].mxu1 }
 0x1c4   :  { %v1465_v4 = vpop.f32.mrb[110].mxu0 }
 0x1c5   :  { %v1467_v43 = vpop.f32.mrb[111].mxu0  ;;  %v1623_v7 = vpop.f32.mrb[110].mxu1 }
 0x1c6   :  { %v1625_v30 = vpop.f32.mrb[111].mxu1 }
 0x1c8   :  { %v1471_v14 = vpop.f32.mrb[112].mxu0 }
 0x1c9   :  { %v1687_v0 = vadd.f32 %v1471_v14, %v3656_v32  ;;  %v1628_v53 = vpop.f32.mrb[112].mxu1  ;;  %v1473_v42 = vpop.f32.mrb[113].mxu0 }
 0x1ca   :  { %v1689_v10 = vadd.f32 %v1628_v53, %v1449_v50  ;;  %v1688_v13 = vadd.f32 %v1473_v42, %v1447_v60  ;;  %v1630_v35 = vpop.f32.mrb[113].mxu1 }
 0x1cb   :  { %v1690_v49 = vadd.f32 %v1630_v35, %v1608_v48 }
 0x1cc   :  { %v1477_v57 = vpop.f32.mrb[114].mxu0 }
 0x1cd   :  { %vm1818_vm4 = vcmp.gt.f32.partialorder %v1690_v49, 0.0  ;;  %v1882_v22 = vmul.f32 0.01, %v1690_v49  ;;  %v3761_v33 = vadd.f32 %v1477_v57, %v3658_v23  ;;  %v1634_v16 = vpop.f32.mrb[114].mxu1  ;;  %v1479_v26 = vpop.f32.mrb[115].mxu0 }
 0x1ce   :  { %v3763_v63 = vadd.f32 %v1634_v16, %v1455_v61  ;;  %v1704_v21 = vadd.f32 %v1479_v26, %v1453_v8  ;;  %v1636_v62 = vpop.f32.mrb[115].mxu1 }
 0x1cf   :  { %v1946_v46 = vsel %vm1818_vm4, %v1690_v49, %v1882_v22  ;;  %v1706_v32 = vadd.f32 %v1636_v62, %v1613_v24 }
 0x1d0   :  { %v3766_v40 = vadd.f32 %v1946_v46, %v3718_v20  ;;  %v1483_v60 = vpop.f32.mrb[116].mxu0 }
 0x1d1   :  { %vm1834_vm5 = vcmp.gt.f32.partialorder %v1706_v32, 0.0  ;;  %v1898_v50 = vmul.f32 0.01, %v1706_v32  ;;  %v3769_v48 = vadd.f32 %v1483_v60, %v3664_v2  ;;  %v1640_v19 = vpop.f32.mrb[116].mxu1  ;;  %v1485_v23 = vpop.f32.mrb[117].mxu0 }
 0x1d2   :  { %v3771_v30 = vadd.f32 %v1640_v19, %v1461_v58  ;;  %v3773_v14 = vadd.f32 %v1485_v23, %v1459_v37  ;;  %v1642_v61 = vpop.f32.mrb[117].mxu1 }
 0x1d3   :  { %v1962_v8 = vsel %vm1834_vm5, %v1706_v32, %v1898_v50  ;;  %v1722_v53 = vadd.f32 %v1642_v61, %v1618_v51 }
 0x1d4   :  { %v3776_v24 = vadd.f32 %v1962_v8, %v3733_v28  ;;  %v1489_v20 = vpop.f32.mrb[118].mxu0 }
 0x1d5   :  { %vm1850_vm0 = vcmp.gt.f32.partialorder %v1722_v53, 0.0  ;;  %v1914_v42 = vmul.f32 0.01, %v1722_v53  ;;  %v3779_v35 = vadd.f32 %v1489_v20, %v3666_v45  ;;  %v1646_v2 = vpop.f32.mrb[118].mxu1  ;;  %v1491_v49 = vpop.f32.mrb[119].mxu0 }
 0x1d6   :  { %v3781_v57 = vadd.f32 %v1646_v2, %v1467_v43  ;;  %v3783_v58 = vadd.f32 %v1491_v49, %v1465_v4  ;;  %v1648_v37 = vpop.f32.mrb[119].mxu1 }
 0x1d7   :  { %v1978_v22 = vsel %vm1850_vm0, %v1722_v53, %v1914_v42  ;;  %v1738_v16 = vadd.f32 %v1648_v37, %v1623_v7 }
 0x1d8   :  { %v3786_v51 = vadd.f32 %v1978_v22, %v3746_v5  ;;  %v1495_v28 = vpop.f32.mrb[120].mxu0 }
 0x1d9   :  { %vm1866_vm6 = vcmp.gt.f32.partialorder %v1738_v16, 0.0  ;;  %v1930_v26 = vmul.f32 0.01, %v1738_v16  ;;  %v1750_v62 = vadd.f32 %v3669_v9, %v1495_v28  ;;  %v1652_v46 = vpop.f32.mrb[120].mxu1  ;;  %v1497_v45 = vpop.f32.mrb[121].mxu0 }
 0x1da   :  { %v1752_v32 = vadd.f32 %v1688_v13, %v1652_v46  ;;  %v1751_v60 = vadd.f32 %v1687_v0, %v1497_v45  ;;  %v1654_v50 = vpop.f32.mrb[121].mxu1 }
 0x1db   :  { %v1994_v43 = vsel %vm1866_vm6, %v1738_v16, %v1930_v26  ;;  %vm1814_vm7 = vcmp.gt.f32.partialorder %v1750_v62, 0.0  ;;  %v1878_v4 = vmul.f32 0.01, %v1750_v62  ;;  %v1753_v19 = vadd.f32 %v1689_v10, %v1654_v50 }
 0x1dc   :  { %v3790_v23 = vadd.f32 %v1994_v43, %v3755_v17  ;;  %vm1816_vm8 = vcmp.gt.f32.partialorder %v1752_v32, 0.0  ;;  %v1880_v5 = vmul.f32 0.01, %v1752_v32  ;;  %vm1815_vm9 = vcmp.gt.f32.partialorder %v1751_v60, 0.0  ;;  %v1501_v7 = vpop.f32.mrb[122].mxu0 }
 0x1dd   :  { %v1942_v61 = vsel %vm1814_vm7, %v1750_v62, %v1878_v4  ;;  %v1879_v8 = vmul.f32 0.01, %v1751_v60  ;;  %vm1817_vm10 = vcmp.gt.f32.partialorder %v1753_v19, 0.0  ;;  %v1881_v9 = vmul.f32 0.01, %v1753_v19  ;;  %v1658_v53 = vpop.f32.mrb[122].mxu1 }
 0x1de   :  { %v2006_v13 = vadd.f32 %v1942_v61, %v3615_v6  ;;  %v1944_v0 = vsel %vm1816_vm8, %v1752_v32, %v1880_v5  ;;  %v1766_v20 = vadd.f32 %v3672_v54, %v1501_v7  ;;  %v1768_v42 = vadd.f32 %v1704_v21, %v1658_v53  ;;  %v1503_v2 = vpop.f32.mrb[123].mxu0  ;;  %v1660_v10 = vpop.f32.mrb[123].mxu1 }
 0x1df   :  { %v3795_v17 = vadd.f32 %v1944_v0, %v3712_v36  ;;  %v1943_v49 = vsel %vm1815_vm9, %v1751_v60, %v1879_v8  ;;  %v1945_v37 = vsel %vm1817_vm10, %v1753_v19, %v1881_v9  ;;  %v1767_v22 = vadd.f32 %v3761_v33, %v1503_v2 }
 0x1e0   :  { %v2099_v16 = vmax.f32 %v3701_v55, %v2006_v13  ;;  %v2007_v28 = vadd.f32 %v1943_v49, %v3709_v12  ;;  %v3801_v26 = vadd.f32 %v1945_v37, %v3714_v39  ;;  %vm1830_vm11 = vcmp.gt.f32.partialorder %v1766_v20, 0.0  ;;  %v1507_v6 = vpop.f32.mrb[124].mxu0 }
 0x1e1   :  { %v1894_v54 = vmul.f32 0.01, %v1766_v20  ;;  %vm1832_vm12 = vcmp.gt.f32.partialorder %v1768_v42, 0.0  ;;  %v1896_v21 = vmul.f32 0.01, %v1768_v42  ;;  %vm1831_vm13 = vcmp.gt.f32.partialorder %v1767_v22, 0.0 }
 0x1e2   :  { %v3803_v62 = vmax.f32 %v2099_v16, %v2007_v28  ;;  %v1895_v36 = vmul.f32 0.01, %v1767_v22  ;;  %v1769_v46 = vadd.f32 %v3763_v63, %v1660_v10  ;;  %v1782_v33 = vadd.f32 %v3679_v41, %v1507_v6  ;;  %v1664_v45 = vpop.f32.mrb[124].mxu1  ;;  %v1509_v55 = vpop.f32.mrb[125].mxu0 }
 0x1e3   :  { %v1958_v32 = vsel %vm1830_vm11, %v1766_v20, %v1894_v54  ;;  %v1960_v12 = vsel %vm1832_vm12, %v1768_v42, %v1896_v21  ;;  %v1784_v39 = vadd.f32 %v3773_v14, %v1664_v45  ;;  %v1783_v60 = vadd.f32 %v3769_v48, %v1509_v55  ;;  %v1666_v50 = vpop.f32.mrb[125].mxu1 }
 0x1e4   :  { %v2022_v43 = vadd.f32 %v1958_v32, %v3630_v59  ;;  %v2024_v4 = vadd.f32 %v1960_v12, %v3727_v25  ;;  %v1959_v19 = vsel %vm1831_vm13, %v1767_v22, %v1895_v36  ;;  %vm1833_vm14 = vcmp.gt.f32.partialorder %v1769_v46, 0.0  ;;  %v1513_v5 = vpop.f32.mrb[126].mxu0 }
 0x1e5   :  { %v2023_v63 = vadd.f32 %v1959_v19, %v3723_v44  ;;  %v1897_v7 = vmul.f32 0.01, %v1769_v46  ;;  %vm1846_vm15 = vcmp.gt.f32.partialorder %v1782_v33, 0.0  ;;  %v1910_v41 = vmul.f32 0.01, %v1782_v33  ;;  %v1670_v61 = vpop.f32.mrb[126].mxu1 }
 0x1e6   :  { %v2100_v8 = vmax.f32 %v3720_v18, %v2022_v43  ;;  %vm1848_vm1 = vcmp.gt.f32.partialorder %v1784_v39, 0.0  ;;  %v1912_v14 = vmul.f32 0.01, %v1784_v39  ;;  %vm1847_vm3 = vcmp.gt.f32.partialorder %v1783_v60, 0.0  ;;  %v1515_v48 = vpop.f32.mrb[127].mxu0  ;;  %v1672_v9 = vpop.f32.mrb[127].mxu1 }
 0x1e7   :  { %v1961_v53 = vsel %vm1833_vm14, %v1769_v46, %v1897_v7  ;;  %v1974_v59 = vsel %vm1846_vm15, %v1782_v33, %v1910_v41  ;;  %v1911_v13 = vmul.f32 0.01, %v1783_v60  ;;  %v1785_v25 = vadd.f32 %v3771_v30, %v1666_v50 }
 0x1e8   :  { %v2104_v0 = vmax.f32 %v2100_v8, %v2023_v63  ;;  %v2025_v20 = vadd.f32 %v1961_v53, %v3729_v38  ;;  %v2038_v44 = vadd.f32 %v1974_v59, %v3643_v31  ;;  %v1976_v42 = vsel %vm1848_vm1, %v1784_v39, %v1912_v14 }
 0x1e9   :  { %v2040_v2 = vadd.f32 %v1976_v42, %v3739_v1  ;;  %v1975_v10 = vsel %vm1847_vm3, %v1783_v60, %v1911_v13  ;;  %vm1849_vm4 = vcmp.gt.f32.partialorder %v1785_v25, 0.0  ;;  %v1913_v18 = vmul.f32 0.01, %v1785_v25 }
 0x1ea   :  { %v2101_v49 = vmax.f32 %v3743_v34, %v2038_v44  ;;  %v2039_v37 = vadd.f32 %v1975_v10, %v3737_v15  ;;  %v1798_v22 = vadd.f32 %v3688_v47, %v1513_v5  ;;  %v1800_v16 = vadd.f32 %v3783_v58, %v1670_v61 }
 0x1eb   :  { %v1977_v30 = vsel %vm1849_vm4, %v1785_v25, %v1913_v18  ;;  %v1799_v28 = vadd.f32 %v3779_v35, %v1515_v48  ;;  %v1801_v38 = vadd.f32 %v3781_v57, %v1672_v9  ;;  %v2107_v31 = vmax.f32 %v3803_v62, %v3795_v17 }
 0x1ec   :  { %v2105_v1 = vmax.f32 %v2101_v49, %v2039_v37  ;;  %v2041_v6 = vadd.f32 %v1977_v30, %v3741_v56  ;;  %vm1862_vm5 = vcmp.gt.f32.partialorder %v1798_v22, 0.0  ;;  %v1926_v54 = vmul.f32 0.01, %v1798_v22 }
 0x1ed   :  { %vm1864_vm0 = vcmp.gt.f32.partialorder %v1800_v16, 0.0  ;;  %v1928_v34 = vmul.f32 0.01, %v1800_v16  ;;  %vm1863_vm6 = vcmp.gt.f32.partialorder %v1799_v28, 0.0  ;;  %v1927_v15 = vmul.f32 0.01, %v1799_v28 }
 0x1ee   :  { %v1990_v47 = vsel %vm1862_vm5, %v1798_v22, %v1926_v54  ;;  %vm1865_vm7 = vcmp.gt.f32.partialorder %v1801_v38, 0.0  ;;  %v1929_v58 = vmul.f32 0.01, %v1801_v38  ;;  %v2108_v21 = vmax.f32 %v2104_v0, %v2024_v4 }
 0x1ef   :  { %v2054_v35 = vadd.f32 %v1990_v47, %v3652_v27  ;;  %v1992_v36 = vsel %vm1864_vm0, %v1800_v16, %v1928_v34  ;;  %v1991_v57 = vsel %vm1863_vm6, %v1799_v28, %v1927_v15  ;;  %v2111_v46 = vmax.f32 %v2107_v31, %v3801_v26 }
 0x1f0   :  { %v2056_v17 = vadd.f32 %v1992_v36, %v3751_v52  ;;  %v2055_v56 = vadd.f32 %v1991_v57, %v3749_v11  ;;  %v1993_v62 = vsel %vm1865_vm7, %v1801_v38, %v1929_v58  ;;  %v2112_v33 = vmax.f32 %v2108_v21, %v2025_v20 }
 0x1f1   :  { %v2102_v45 = vmax.f32 %v3757_v29, %v2054_v35  ;;  %v2057_v55 = vadd.f32 %v1993_v62, %v3753_v3  ;;  %v2115_v32 = vmax.f32 %v2111_v46, %v3766_v40  ;;  %v2109_v12 = vmax.f32 %v2105_v1, %v2040_v2  ;;  %v2120_v3 = vld [vmem:[%s3860_s2 + $0x8] sm:$0xff]  ;;  %v2121_v40 = vld [vmem:[%s3861_s3] sm:$0xff]  ;;  %s2608_s2 = scalar_lea.vmem %s2213_s5, 256 }
 0x1f2   :  { %v2116_v39 = vmax.f32 %v2112_v33, %v3776_v24  ;;  %v2122_v29 = vld [vmem:[%s3861_s3 + $0x8] sm:$0xff]  ;;  %p2609_p0 = scmp.ne.s32.totalorder %s2213_s5, %s2608_s2  ;;  %p2614_p2 = scmp.lt.s32.totalorder %s2608_s2, %s2608_s2 }
 0x1f3   :  { %v2106_v27 = vmax.f32 %v2102_v45, %v2055_v56  ;;  %v2113_v60 = vmax.f32 %v2109_v12, %v2041_v6 }
 0x1f4   :  { %v2594_v50 = vpack.c.bf16 %v2116_v39, %v2115_v32  ;;  %p2615_p3 = por %p2614_p2, %p2613_p1 }
 0x1f5   :  { %v2110_v43 = vmax.f32 %v2106_v27, %v2056_v17  ;;  %v2117_v26 = vmax.f32 %v2113_v60, %v3786_v51 }
 0x1f6   :  { %2595 = vmatprep.subr.bf16.mxu0 %v2594_v50  ;;  %p2616_p4 = pnand %p2615_p3, %p2609_p0 }
 0x1f7   :  { %2597 = vmatpush3.bf16.msra.mxu0 %v2594_v50  ;;  %v2114_v11 = vmax.f32 %v2110_v43, %v2057_v55 }
 0x1f9   :  { %v2118_v52 = vmax.f32 %v2114_v11, %v3790_v23 }
 0x1fb   :  { %v2598_v4 = vpack.c.bf16 %v2118_v52, %v2117_v26 }
 0x1fd   :  { %2599 = vmatprep.subr.bf16.mxu0 %v2598_v4 }
 0x1fe   :  { %2601 = vmatpush3.bf16.msra.mxu0 %v2598_v4 }
 0x201   :  { %2528 = vmatmul.mubr.msk.f32.vlgmr.msra.gmra.mrb[128].mxu0 %vm2123_vm2, %v2120_v3 }
 0x2d4   :  { %v2529_v24 = vpop.f32.mrb[128].mxu0 }
 0x2d5   :  { %v2202_v51 = vadd.f32 %v2529_v24, %v2122_v29  ;;  %v2196_v23 = vpop.f32.mrb[129].mxu0 }
 0x2d6   :  { %v2197_v19 = vadd.f32 %v2196_v23, %v2121_v40 }
 0x2d7   :  { %2206 = vst [vmem:[#allocation2 + $0x8] sm:$0xff] %v2202_v51 }
 0x2d8   :  { %2205 = vst [vmem:[#allocation2] sm:$0xff] %v2197_v19 }
 0x2d9   :  { %2619 = shalt.err (!%p2616_p4)
}
 0x2da   :  { %s2620_s3 = scalar_lea.hbm %s3862_s4, 256 }
 0x2db   :  { %p2621_p5 = scmp.ne.s32.totalorder %s3862_s4, %s2620_s3  ;;  %p2624_p6 = scmp.lt.u32.totalorder %s2620_s3, %s3862_s4 }
 0x2dd   :  { %p2626_p7 = pnand %p2624_p6, %p2621_p5 }
 0x2df   :  { %2629 = shalt.err (!%p2626_p7)
}
 0x2e0   :  { %s2636_s12 = smov 128   ;;  %s2637_s13 = smov 8  }
 0x2e1   :  { %2218 = dma.vmem_to_hbm [thread:$0]  %s2213_s5, 256, %s3862_s4, [#allocation3], %s2636_s12, %s2636_s12, %s2637_s13  }
 0x2e2   :  { %2630 = dma.done.wait [#allocation3], 256  }
 0x2e3   :  { %2631 = vsyncadd [#allocation3], 4294967040 }
 0x2e4   :  { %2222 = vsyncpa [#allocation3], 1 }

</bundles_post_ra>
